<compile_context>
chip_gen: v7x
topology: tpu7x:2x2x1
jax: 0.10.0
libtpu: 0.0.40
codegen_flags: <defaults>
</compile_context>

<pallas_src>
import functools

import jax
import jax.numpy as jnp
from jax.experimental import pallas as pl
from jax.experimental.pallas import tpu as pltpu


def _round_up(n: int, m: int) -> int:
    return ((n + m - 1) // m) * m


# --------------------------------------------------------------------------
# Shared predictor core (operates on one batch row: values are 2-D [Tp, *])
# --------------------------------------------------------------------------
def _predictor_core(x, w1_ref, b1_ref, g1_ref, be1_ref,
                    w2_ref, b2_ref, g2_ref, be2_ref,
                    w3_ref, b3_ref, *, k, t_valid):
    """Conv1d -> ReLU -> LN -> Conv1d -> ReLU -> LN -> Linear(F,1) -> ReLU."""
    tp = x.shape[0]
    padl = (k - 1) // 2
    padr = k - 1 - padl
    # TODO(synk): even kernel_size gives torch output length T-1 (padding is
    # symmetric (k-1)//2); here we assume the usual odd kernel_size.
    row = jax.lax.broadcasted_iota(jnp.int32, (tp, 1), 0)
    valid = row < t_valid

    def conv(xin, w_ref, b_ref):
        c = xin.shape[1]
        parts = []
        if padl:
            parts.append(jnp.zeros((padl, c), xin.dtype))
        parts.append(xin)
        if padr:
            parts.append(jnp.zeros((padr, c), xin.dtype))
        xp = jnp.concatenate(parts, axis=0) if len(parts) > 1 else xin
        # Fold the k taps into one matmul: [Tp, k*C] @ [k*C, F] on the MXU
        # (bf16 operands, f32 accumulate).
        if k > 1:
            xk = jnp.concatenate([xp[j:j + tp, :] for j in range(k)], axis=-1)
        else:
            xk = xp
        return jnp.dot(xk.astype(jnp.bfloat16), w_ref[...],
                       preferred_element_type=jnp.float32) + b_ref[...]

    def layer_norm(h, g_ref, be_ref):
        # One-pass mean / mean-of-squares (var = E[x^2] - E[x]^2), f32 math.
        mu = jnp.mean(h, axis=-1, keepdims=True)
        ms = jnp.mean(h * h, axis=-1, keepdims=True)
        inv = jax.lax.rsqrt(ms - mu * mu + 1e-5)
        return (h - mu) * inv * g_ref[...] + be_ref[...]

    h = layer_norm(jnp.maximum(conv(x, w1_ref, b1_ref), 0.0), g1_ref, be1_ref)
    # Zero the time-pad region so conv #2's halo matches torch's zero padding
    # at position t_valid - 1 (the original sequence is only t_valid long).
    h = jnp.where(valid, h, 0.0)
    h2 = layer_norm(jnp.maximum(conv(h, w2_ref, b2_ref), 0.0), g2_ref, be2_ref)

    # Linear(F -> 1): VPU multiply + lane reduction instead of an N=1 matmul.
    pred = jnp.sum(h2 * w3_ref[...], axis=-1, keepdims=True) + b3_ref[...]
    pred = jnp.maximum(pred, 0.0)            # final ReLU, shape [Tp, 1] f32
    return pred, valid


def _bucketize_embed(pred, bounds_ref, table_ref, n_bins):
    """torch.bucketize(right=False) + nn.Embedding lookup, no one-hot matmul."""
    # idx = #{ boundaries < v }; boundaries are scalars in SMEM.
    idx = jnp.zeros(pred.shape, jnp.int32)
    for j in range(n_bins - 1):
        idx = idx + (pred > bounds_ref[0, j]).astype(jnp.int32)
    # n_bins selects over the (small) table row-by-row.
    # TODO(synk): for large n_bins (e.g. 256) switch to a DMA / one-hot gather.
    table = table_ref[...].astype(jnp.float32)            # [n_bins, D]
    emb = jnp.zeros((pred.shape[0], table.shape[1]), jnp.float32)
    for n in range(n_bins):
        emb = emb + jnp.where(idx == n, table[n:n + 1, :], 0.0)
    return emb


# --------------------------------------------------------------------------
# Pallas kernels
# --------------------------------------------------------------------------
def duration_kernel(x_ref, w1_ref, b1_ref, g1_ref, be1_ref,
                    w2_ref, b2_ref, g2_ref, be2_ref, w3_ref, b3_ref,
                    pred_ref, *, k, t_valid, alpha):
    x = x_ref[...].astype(jnp.float32)                    # [Tp, Cin]
    pred, _ = _predictor_core(x, w1_ref, b1_ref, g1_ref, be1_ref,
                              w2_ref, b2_ref, g2_ref, be2_ref,
                              w3_ref, b3_ref, k=k, t_valid=t_valid)
    pred_ref[...] = pred * alpha                          # [Tp, 1]


def pitch_energy_kernel(x_ref,
                        pw1, pb1, pg1, pbe1, pw2, pb2, pg2, pbe2, pw3, pb3,
                        ew1, eb1, eg1, ebe1, ew2, eb2, eg2, ebe2, ew3, eb3,
                        pbounds_ref, ptable_ref, ebounds_ref, etable_ref,
                        out_ref, ppred_ref, epred_ref,
                        *, k, t_valid, alpha_p, alpha_e, nbins_p, nbins_e):
    """Both variance stages fused: predictor -> bucketize -> embed -> add, x2.

    Activations [Tp, D] are loaded from HBM once and stored once per batch
    element instead of twice (pitch stage + energy stage).
    """
    x = x_ref[...].astype(jnp.float32)                    # [Tp, D]

    # ---------------- pitch ----------------
    pred_p, valid = _predictor_core(x, pw1, pb1, pg1, pbe1, pw2, pb2, pg2,
                                    pbe2, pw3, pb3, k=k, t_valid=t_valid)
    pred_p = pred_p * alpha_p                             # [Tp, 1]
    ppred_ref[...] = pred_p
    emb_p = _bucketize_embed(pred_p, pbounds_ref, ptable_ref, nbins_p)
    # Keep the time-pad region zeroed so the energy conv halo still sees
    # torch-style zero padding at t_valid.
    y = jnp.where(valid, x + emb_p, 0.0)

    # ---------------- energy ----------------
    pred_e, _ = _predictor_core(y, ew1, eb1, eg1, ebe1, ew2, eb2, eg2,
                                ebe2, ew3, eb3, k=k, t_valid=t_valid)
    pred_e = pred_e * alpha_e                             # [Tp, 1]
    epred_ref[...] = pred_e
    emb_e = _bucketize_embed(pred_e, ebounds_ref, etable_ref, nbins_e)
    out_ref[...] = jnp.where(valid, y + emb_e, 0.0).astype(out_ref.dtype)


# --------------------------------------------------------------------------
# pallas_call wrappers
# --------------------------------------------------------------------------
def _const_spec(shape):
    """Full-array block with a constant index map (stays resident in VMEM)."""
    zeros = (0,) * len(shape)
    return pl.BlockSpec(shape, lambda b, _z=zeros: _z)


def _predictor_weight_args(p):
    """Flatten conv weights to [k*Cin, F] (bf16 for the MXU) + other params."""
    k, cin, f = p['w1'].shape
    w1 = p['w1'].reshape(k * cin, f).astype(jnp.bfloat16)
    w2 = p['w2'].reshape(k * f, f).astype(jnp.bfloat16)
    w3 = p['w3'].reshape(1, f)                 # [F, 1] -> [1, F] row (f32)
    args = (w1, p['b1'], p['g1'], p['be1'],
            w2, p['b2'], p['g2'], p['be2'], w3, p['b3'])
    specs = [_const_spec(a.shape) for a in args]
    return args, specs, k


def run_duration_predictor(x_pad, p, t_valid, alpha):
    """x_pad: [B, Tp, C] (rows >= t_valid are zero) -> durations [B, t_valid]."""
    B, Tp, C = x_pad.shape
    w_args, w_specs, k = _predictor_weight_args(p)
    kern = functools.partial(duration_kernel, k=k, t_valid=t_valid,
                             alpha=float(alpha))
    pred = pl.pallas_call(
        kern,
        grid=(B,),
        in_specs=[pl.BlockSpec((None, Tp, C), lambda b: (b, 0, 0))] + w_specs,
        out_specs=pl.BlockSpec((None, Tp, 1), lambda b: (b, 0, 0)),
        out_shape=jax.ShapeDtypeStruct((B, Tp, 1), jnp.float32),
        compiler_params=pltpu.CompilerParams(
            dimension_semantics=("parallel",)),
    )(x_pad, *w_args)
    return pred[:, :t_valid, 0]


def run_pitch_energy(x_pad, p_pitch, p_energy, p_bounds, p_table,
                     e_bounds, e_table, t_valid, alpha_p, alpha_e):
    """Fused pitch+energy predictors + bucketize + embedding + residual adds.

    x_pad:    [B, Tp, D] f32, rows >= t_valid are zero.
    *_bounds: [1, n_bins-1] f32, *_table: [n_bins, D] f32.
    Returns (out_pad [B, Tp, D], pitches [B, t_valid], energies [B, t_valid]).
    """
    B, Tp, D = x_pad.shape
    pw_args, pw_specs, k = _predictor_weight_args(p_pitch)
    ew_args, ew_specs, _ = _predictor_weight_args(p_energy)
    smem_spec = pl.BlockSpec(memory_space=pltpu.MemorySpace.SMEM)
    kern = functools.partial(pitch_energy_kernel, k=k, t_valid=t_valid,
                             alpha_p=float(alpha_p), alpha_e=float(alpha_e),
                             nbins_p=int(p_table.shape[0]),
                             nbins_e=int(e_table.shape[0]))
    out, ppred, epred = pl.pallas_call(
        kern,
        grid=(B,),
        in_specs=([pl.BlockSpec((None, Tp, D), lambda b: (b, 0, 0))]
                  + pw_specs + ew_specs
                  + [smem_spec, _const_spec(p_table.shape),     # pitch q / emb
                     smem_spec, _const_spec(e_table.shape)]),   # energy q / emb
        out_specs=(pl.BlockSpec((None, Tp, D), lambda b: (b, 0, 0)),
                   pl.BlockSpec((None, Tp, 1), lambda b: (b, 0, 0)),
                   pl.BlockSpec((None, Tp, 1), lambda b: (b, 0, 0))),
        out_shape=(jax.ShapeDtypeStruct((B, Tp, D), jnp.float32),
                   jax.ShapeDtypeStruct((B, Tp, 1), jnp.float32),
                   jax.ShapeDtypeStruct((B, Tp, 1), jnp.float32)),
        compiler_params=pltpu.CompilerParams(
            dimension_semantics=("parallel",)),
    )(x_pad, *pw_args, *ew_args, p_bounds, p_table, e_bounds, e_table)
    return out, ppred[:, :t_valid, 0], epred[:, :t_valid, 0]


# --------------------------------------------------------------------------
# Length regulator (plain-JAX glue: data-dependent ragged expansion)
# --------------------------------------------------------------------------
def length_regulate(x, dur, max_len, padded_len):
    """x: [B, T, D], dur: [B, T] int32 -> ([B, padded_len, D], mel_pos [1, max_len]).

    Rows in [max_len, padded_len) and rows beyond each sample's expanded length
    are zero, matching torch's zero-padded output of length max_len.
    """
    # TODO(synk): torch's LengthRegulator yields dynamic per-sample mel lengths;
    # here we expand into a static buffer (zero padded) like pad(..., max_len).
    cum = jnp.cumsum(dur, axis=1)                               # [B, T]
    t = jnp.arange(padded_len)                                  # [Mp]
    src = jnp.sum((cum[:, None, :] <= t[None, :, None]).astype(jnp.int32),
                  axis=-1)                                      # [B, Mp]
    total = cum[:, -1]
    valid = ((t[None, :] < total[:, None]) &
             (t[None, :] < max_len)).astype(x.dtype)            # [B, Mp]
    src = jnp.minimum(src, x.shape[1] - 1)
    out = jnp.take_along_axis(x, src[..., None], axis=1) * valid[..., None]
    mel_pos = (jnp.arange(max_len) + 1)[None, :].astype(jnp.int32)
    return out, mel_pos


# --------------------------------------------------------------------------
# VarianceAdaptor forward (inference semantics: no true_* targets, no dropout)
# --------------------------------------------------------------------------
def variance_adaptor(inputs, params, mel_max_len, alphas=(1.0, 1.0, 1.0)):
    B, T, C = inputs.shape
    Tp = _round_up(T, 128)
    x_pad = jnp.pad(inputs, ((0, 0), (0, Tp - T), (0, 0)))     # one pad, once

    durations = run_duration_predictor(x_pad, params['duration'],
                                       T, alphas[0])            # [B, T]

    # torch uses durations.long() (truncation toward zero) at inference;
    # astype(int32) on non-negative relu'd durations matches that exactly.
    Mp = _round_up(mel_max_len, 128)
    lr_out, mel_pos = length_regulate(inputs, durations.astype(jnp.int32),
                                      mel_max_len, Mp)          # [B, Mp, C]

    out_pad, pitches, energies = run_pitch_energy(
        lr_out, params['pitch'], params['energy'],
        params['pitch_quantization'], params['pitch_embedding'],
        params['energy_quantization'], params['energy_embedding'],
        mel_max_len, alphas[1], alphas[2])

    outputs = out_pad[:, :mel_max_len, :]
    return outputs, (durations, pitches, energies), mel_pos


# --------------------------------------------------------------------------
# Deterministic parameter construction
# --------------------------------------------------------------------------
def init_predictor_params(key, in_ch, filt, k, final_bias=0.0):
    k1, k2, k3 = jax.random.split(key, 3)
    return dict(
        w1=0.1 * jax.random.normal(k1, (k, in_ch, filt), jnp.float32),
        b1=jnp.zeros((1, filt), jnp.float32),
        g1=jnp.ones((1, filt), jnp.float32),        # LayerNorm weight
        be1=jnp.zeros((1, filt), jnp.float32),      # LayerNorm bias
        w2=0.1 * jax.random.normal(k2, (k, filt, filt), jnp.float32),
        b2=jnp.zeros((1, filt), jnp.float32),
        g2=jnp.ones((1, filt), jnp.float32),
        be2=jnp.zeros((1, filt), jnp.float32),
        w3=0.1 * jax.random.normal(k3, (filt, 1), jnp.float32),
        b3=jnp.full((1, 1), final_bias, jnp.float32),
    )


if __name__ == "__main__":
    B, T, C = 2, 8, 32          # batch, source seq len, in_channels == encoder_dim
    filt, k, n_bins = 32, 3, 8  # filter_channels, kernel_size, n_bins
    enc_dim = C
    mel_max_len = 16

    key = jax.random.PRNGKey(0)
    k_in, k_dur, k_pit, k_en, k_pe, k_ee = jax.random.split(key, 6)
    inputs = jax.random.normal(k_in, (B, T, C), jnp.float32)

    params = dict(
        duration=init_predictor_params(k_dur, C, filt, k, final_bias=2.0),
        pitch=init_predictor_params(k_pit, C, filt, k),
        energy=init_predictor_params(k_en, C, filt, k),
        pitch_quantization=jnp.linspace(0.0, 300.0, n_bins - 1,
                                        dtype=jnp.float32).reshape(1, -1),
        energy_quantization=jnp.linspace(0.0, 200.0, n_bins - 1,
                                         dtype=jnp.float32).reshape(1, -1),
        pitch_embedding=0.1 * jax.random.normal(k_pe, (n_bins, enc_dim), jnp.float32),
        energy_embedding=0.1 * jax.random.normal(k_ee, (n_bins, enc_dim), jnp.float32),
    )

    outputs, (dur, pit, en), mel_pos = variance_adaptor(inputs, params, mel_max_len)
    jax.block_until_ready((outputs, dur, pit, en, mel_pos))
    assert outputs.shape == (B, mel_max_len, enc_dim)
    assert dur.shape == (B, T) and pit.shape == (B, mel_max_len)
    assert en.shape == (B, mel_max_len) and mel_pos.shape == (1, mel_max_len)
    assert bool(jnp.all(jnp.isfinite(outputs)))
    print("KERNEL_OK")
</pallas_src>

<mosaic_0001>
module attributes {stable_mosaic.version = 11 : i64} {
  func.func @duration_kernel(%arg0: i32, %arg1: memref<1x128x32xf32, #tpu.memory_space<vmem>>, %arg2: memref<96x32xbf16, #tpu.memory_space<vmem>>, %arg3: memref<1x32xf32, #tpu.memory_space<vmem>>, %arg4: memref<1x32xf32, #tpu.memory_space<vmem>>, %arg5: memref<1x32xf32, #tpu.memory_space<vmem>>, %arg6: memref<96x32xbf16, #tpu.memory_space<vmem>>, %arg7: memref<1x32xf32, #tpu.memory_space<vmem>>, %arg8: memref<1x32xf32, #tpu.memory_space<vmem>>, %arg9: memref<1x32xf32, #tpu.memory_space<vmem>>, %arg10: memref<1x32xf32, #tpu.memory_space<vmem>>, %arg11: memref<1x1xf32, #tpu.memory_space<vmem>>, %arg12: memref<1x128x1xf32, #tpu.memory_space<vmem>>) attributes {dimension_semantics = [#tpu.dimension_semantics<parallel>], iteration_bounds = array<i64: 2>, scalar_prefetch = 0 : i64, scratch_operands = 0 : i64, tpu.core_type = #tpu.core_type<tc>, window_params = [{transform_indices = @transform_0, window_bounds = array<i64: 1, 128, 32>}, {pipeline_mode = #tpu.pipeline_mode<synchronous>, transform_indices = @transform_1, window_bounds = array<i64: 96, 32>}, {pipeline_mode = #tpu.pipeline_mode<synchronous>, transform_indices = @transform_2, window_bounds = array<i64: 1, 32>}, {pipeline_mode = #tpu.pipeline_mode<synchronous>, transform_indices = @transform_3, window_bounds = array<i64: 1, 32>}, {pipeline_mode = #tpu.pipeline_mode<synchronous>, transform_indices = @transform_4, window_bounds = array<i64: 1, 32>}, {pipeline_mode = #tpu.pipeline_mode<synchronous>, transform_indices = @transform_5, window_bounds = array<i64: 96, 32>}, {pipeline_mode = #tpu.pipeline_mode<synchronous>, transform_indices = @transform_6, window_bounds = array<i64: 1, 32>}, {pipeline_mode = #tpu.pipeline_mode<synchronous>, transform_indices = @transform_7, window_bounds = array<i64: 1, 32>}, {pipeline_mode = #tpu.pipeline_mode<synchronous>, transform_indices = @transform_8, window_bounds = array<i64: 1, 32>}, {pipeline_mode = #tpu.pipeline_mode<synchronous>, transform_indices = @transform_9, window_bounds = array<i64: 1, 32>}, {pipeline_mode = #tpu.pipeline_mode<synchronous>, transform_indices = @transform_10, window_bounds = array<i64: 1, 1>}, {transform_indices = @transform_11, window_bounds = array<i64: 1, 128, 1>}]} {
    %c0 = arith.constant 0 : index
    %c0_0 = arith.constant 0 : index
    %c0_1 = arith.constant 0 : index
    %0 = vector.load %arg1[%c0, %c0_0, %c0_1] : memref<1x128x32xf32, #tpu.memory_space<vmem>>, vector<1x128x32xf32>
    %1 = vector.shape_cast %0 : vector<1x128x32xf32> to vector<128x32xf32>
    %2 = tpu.iota {dimensions = array<i32: 0>} : vector<128x1xi32>
    %c8_i32 = arith.constant 8 : i32
    %3 = vector.broadcast %c8_i32 : i32 to vector<128x1xi32>
    %4 = arith.cmpi slt, %2, %3 : vector<128x1xi32>
    %cst = arith.constant 0.000000e+00 : f32
    %5 = vector.broadcast %cst : f32 to vector<1x32xf32>
    %cst_2 = arith.constant 0.000000e+00 : f32
    %6 = vector.broadcast %cst_2 : f32 to vector<1x32xf32>
    %7 = tpu.concatenate %5, %1, %6 in 0 : vector<1x32xf32>, vector<128x32xf32>, vector<1x32xf32> -> vector<130x32xf32>
    %8 = vector.extract_strided_slice %7 {offsets = [0, 0], sizes = [128, 32], strides = [1, 1]} : vector<130x32xf32> to vector<128x32xf32>
    %9 = vector.extract_strided_slice %7 {offsets = [1, 0], sizes = [128, 32], strides = [1, 1]} : vector<130x32xf32> to vector<128x32xf32>
    %10 = vector.extract_strided_slice %7 {offsets = [2, 0], sizes = [128, 32], strides = [1, 1]} : vector<130x32xf32> to vector<128x32xf32>
    %11 = tpu.concatenate %8, %9, %10 in 1 : vector<128x32xf32>, vector<128x32xf32>, vector<128x32xf32> -> vector<128x96xf32>
    %12 = arith.truncf %11 : vector<128x96xf32> to vector<128x96xbf16>
    %c0_3 = arith.constant 0 : index
    %c0_4 = arith.constant 0 : index
    %13 = vector.load %arg2[%c0_3, %c0_4] : memref<96x32xbf16, #tpu.memory_space<vmem>>, vector<96x32xbf16>
    %cst_5 = arith.constant dense<0.000000e+00> : vector<128x32xf32>
    %14 = tpu.matmul %12, %13, %cst_5 {dimension_numbers = #tpu.dot_dimension_numbers<[1], [0], [0], [1], [0, 0, 1, 1], [], []>} : vector<128x96xbf16>, vector<96x32xbf16>, vector<128x32xf32> -> vector<128x32xf32>
    %c0_6 = arith.constant 0 : index
    %c0_7 = arith.constant 0 : index
    %15 = vector.load %arg3[%c0_6, %c0_7] : memref<1x32xf32, #tpu.memory_space<vmem>>, vector<1x32xf32>
    %16 = vector.broadcast %15 : vector<1x32xf32> to vector<128x32xf32>
    %17 = arith.addf %14, %16 : vector<128x32xf32>
    %cst_8 = arith.constant 0.000000e+00 : f32
    %18 = vector.broadcast %cst_8 : f32 to vector<128x32xf32>
    %19 = arith.maximumf %17, %18 : vector<128x32xf32>
    %cst_9 = arith.constant dense<0.000000e+00> : vector<128xf32>
    %20 = vector.multi_reduction <add>, %19, %cst_9 [1] : vector<128x32xf32> to vector<128xf32>
    %21 = vector.shape_cast %20 : vector<128xf32> to vector<128x1xf32>
    %cst_10 = arith.constant 3.200000e+01 : f32
    %22 = vector.broadcast %cst_10 : f32 to vector<128x1xf32>
    %23 = arith.divf %21, %22 : vector<128x1xf32>
    %24 = arith.mulf %19, %19 : vector<128x32xf32>
    %cst_11 = arith.constant dense<0.000000e+00> : vector<128xf32>
    %25 = vector.multi_reduction <add>, %24, %cst_11 [1] : vector<128x32xf32> to vector<128xf32>
    %26 = vector.shape_cast %25 : vector<128xf32> to vector<128x1xf32>
    %cst_12 = arith.constant 3.200000e+01 : f32
    %27 = vector.broadcast %cst_12 : f32 to vector<128x1xf32>
    %28 = arith.divf %26, %27 : vector<128x1xf32>
    %29 = arith.mulf %23, %23 : vector<128x1xf32>
    %30 = arith.subf %28, %29 : vector<128x1xf32>
    %cst_13 = arith.constant 9.99999974E-6 : f32
    %31 = vector.broadcast %cst_13 : f32 to vector<128x1xf32>
    %32 = arith.addf %30, %31 : vector<128x1xf32>
    %33 = math.rsqrt %32 : vector<128x1xf32>
    %34 = vector.broadcast %23 : vector<128x1xf32> to vector<128x32xf32>
    %35 = arith.subf %19, %34 : vector<128x32xf32>
    %36 = vector.broadcast %33 : vector<128x1xf32> to vector<128x32xf32>
    %37 = arith.mulf %35, %36 : vector<128x32xf32>
    %c0_14 = arith.constant 0 : index
    %c0_15 = arith.constant 0 : index
    %38 = vector.load %arg4[%c0_14, %c0_15] : memref<1x32xf32, #tpu.memory_space<vmem>>, vector<1x32xf32>
    %39 = vector.broadcast %38 : vector<1x32xf32> to vector<128x32xf32>
    %40 = arith.mulf %37, %39 : vector<128x32xf32>
    %c0_16 = arith.constant 0 : index
    %c0_17 = arith.constant 0 : index
    %41 = vector.load %arg5[%c0_16, %c0_17] : memref<1x32xf32, #tpu.memory_space<vmem>>, vector<1x32xf32>
    %42 = vector.broadcast %41 : vector<1x32xf32> to vector<128x32xf32>
    %43 = arith.addf %40, %42 : vector<128x32xf32>
    %cst_18 = arith.constant 0.000000e+00 : f32
    %44 = vector.shape_cast %4 : vector<128x1xi1> to vector<128x1xi1>
    %45 = vector.broadcast %44 : vector<128x1xi1> to vector<128x32xi1>
    %46 = vector.broadcast %cst_18 : f32 to vector<128x32xf32>
    %47 = arith.select %45, %43, %46 : vector<128x32xi1>, vector<128x32xf32>
    %cst_19 = arith.constant 0.000000e+00 : f32
    %48 = vector.broadcast %cst_19 : f32 to vector<1x32xf32>
    %cst_20 = arith.constant 0.000000e+00 : f32
    %49 = vector.broadcast %cst_20 : f32 to vector<1x32xf32>
    %50 = tpu.concatenate %48, %47, %49 in 0 : vector<1x32xf32>, vector<128x32xf32>, vector<1x32xf32> -> vector<130x32xf32>
    %51 = vector.extract_strided_slice %50 {offsets = [0, 0], sizes = [128, 32], strides = [1, 1]} : vector<130x32xf32> to vector<128x32xf32>
    %52 = vector.extract_strided_slice %50 {offsets = [1, 0], sizes = [128, 32], strides = [1, 1]} : vector<130x32xf32> to vector<128x32xf32>
    %53 = vector.extract_strided_slice %50 {offsets = [2, 0], sizes = [128, 32], strides = [1, 1]} : vector<130x32xf32> to vector<128x32xf32>
    %54 = tpu.concatenate %51, %52, %53 in 1 : vector<128x32xf32>, vector<128x32xf32>, vector<128x32xf32> -> vector<128x96xf32>
    %55 = arith.truncf %54 : vector<128x96xf32> to vector<128x96xbf16>
    %c0_21 = arith.constant 0 : index
    %c0_22 = arith.constant 0 : index
    %56 = vector.load %arg6[%c0_21, %c0_22] : memref<96x32xbf16, #tpu.memory_space<vmem>>, vector<96x32xbf16>
    %cst_23 = arith.constant dense<0.000000e+00> : vector<128x32xf32>
    %57 = tpu.matmul %55, %56, %cst_23 {dimension_numbers = #tpu.dot_dimension_numbers<[1], [0], [0], [1], [0, 0, 1, 1], [], []>} : vector<128x96xbf16>, vector<96x32xbf16>, vector<128x32xf32> -> vector<128x32xf32>
    %c0_24 = arith.constant 0 : index
    %c0_25 = arith.constant 0 : index
    %58 = vector.load %arg7[%c0_24, %c0_25] : memref<1x32xf32, #tpu.memory_space<vmem>>, vector<1x32xf32>
    %59 = vector.broadcast %58 : vector<1x32xf32> to vector<128x32xf32>
    %60 = arith.addf %57, %59 : vector<128x32xf32>
    %cst_26 = arith.constant 0.000000e+00 : f32
    %61 = vector.broadcast %cst_26 : f32 to vector<128x32xf32>
    %62 = arith.maximumf %60, %61 : vector<128x32xf32>
    %cst_27 = arith.constant dense<0.000000e+00> : vector<128xf32>
    %63 = vector.multi_reduction <add>, %62, %cst_27 [1] : vector<128x32xf32> to vector<128xf32>
    %64 = vector.shape_cast %63 : vector<128xf32> to vector<128x1xf32>
    %cst_28 = arith.constant 3.200000e+01 : f32
    %65 = vector.broadcast %cst_28 : f32 to vector<128x1xf32>
    %66 = arith.divf %64, %65 : vector<128x1xf32>
    %67 = arith.mulf %62, %62 : vector<128x32xf32>
    %cst_29 = arith.constant dense<0.000000e+00> : vector<128xf32>
    %68 = vector.multi_reduction <add>, %67, %cst_29 [1] : vector<128x32xf32> to vector<128xf32>
    %69 = vector.shape_cast %68 : vector<128xf32> to vector<128x1xf32>
    %cst_30 = arith.constant 3.200000e+01 : f32
    %70 = vector.broadcast %cst_30 : f32 to vector<128x1xf32>
    %71 = arith.divf %69, %70 : vector<128x1xf32>
    %72 = arith.mulf %66, %66 : vector<128x1xf32>
    %73 = arith.subf %71, %72 : vector<128x1xf32>
    %cst_31 = arith.constant 9.99999974E-6 : f32
    %74 = vector.broadcast %cst_31 : f32 to vector<128x1xf32>
    %75 = arith.addf %73, %74 : vector<128x1xf32>
    %76 = math.rsqrt %75 : vector<128x1xf32>
    %77 = vector.broadcast %66 : vector<128x1xf32> to vector<128x32xf32>
    %78 = arith.subf %62, %77 : vector<128x32xf32>
    %79 = vector.broadcast %76 : vector<128x1xf32> to vector<128x32xf32>
    %80 = arith.mulf %78, %79 : vector<128x32xf32>
    %c0_32 = arith.constant 0 : index
    %c0_33 = arith.constant 0 : index
    %81 = vector.load %arg8[%c0_32, %c0_33] : memref<1x32xf32, #tpu.memory_space<vmem>>, vector<1x32xf32>
    %82 = vector.broadcast %81 : vector<1x32xf32> to vector<128x32xf32>
    %83 = arith.mulf %80, %82 : vector<128x32xf32>
    %c0_34 = arith.constant 0 : index
    %c0_35 = arith.constant 0 : index
    %84 = vector.load %arg9[%c0_34, %c0_35] : memref<1x32xf32, #tpu.memory_space<vmem>>, vector<1x32xf32>
    %85 = vector.broadcast %84 : vector<1x32xf32> to vector<128x32xf32>
    %86 = arith.addf %83, %85 : vector<128x32xf32>
    %c0_36 = arith.constant 0 : index
    %c0_37 = arith.constant 0 : index
    %87 = vector.load %arg10[%c0_36, %c0_37] : memref<1x32xf32, #tpu.memory_space<vmem>>, vector<1x32xf32>
    %88 = vector.broadcast %87 : vector<1x32xf32> to vector<128x32xf32>
    %89 = arith.mulf %86, %88 : vector<128x32xf32>
    %cst_38 = arith.constant dense<0.000000e+00> : vector<128xf32>
    %90 = vector.multi_reduction <add>, %89, %cst_38 [1] : vector<128x32xf32> to vector<128xf32>
    %91 = vector.shape_cast %90 : vector<128xf32> to vector<128x1xf32>
    %c0_39 = arith.constant 0 : index
    %c0_40 = arith.constant 0 : index
    %92 = vector.load %arg11[%c0_39, %c0_40] : memref<1x1xf32, #tpu.memory_space<vmem>>, vector<1x1xf32>
    %93 = vector.broadcast %92 : vector<1x1xf32> to vector<128x1xf32>
    %94 = arith.addf %91, %93 : vector<128x1xf32>
    %cst_41 = arith.constant 0.000000e+00 : f32
    %95 = vector.broadcast %cst_41 : f32 to vector<128x1xf32>
    %96 = arith.maximumf %94, %95 : vector<128x1xf32>
    %cst_42 = arith.constant 1.000000e+00 : f32
    %97 = vector.broadcast %cst_42 : f32 to vector<128x1xf32>
    %98 = arith.mulf %96, %97 : vector<128x1xf32>
    %c0_43 = arith.constant 0 : index
    %c0_44 = arith.constant 0 : index
    %c0_45 = arith.constant 0 : index
    %99 = vector.load %arg12[%c0_43, %c0_44, %c0_45] : memref<1x128x1xf32, #tpu.memory_space<vmem>>, vector<1x128x1xf32>
    %100 = vector.shape_cast %99 : vector<1x128x1xf32> to vector<128x1xf32>
    %101 = vector.shape_cast %98 : vector<128x1xf32> to vector<1x128x1xf32>
    tpu.vector_store %arg12[%c0_43, %c0_44, %c0_45], %101 {strides = array<i32>} : memref<1x128x1xf32, #tpu.memory_space<vmem>>, vector<1x128x1xf32>,
    return
  }
  func.func @transform_0(%arg0: i32) -> (i32, i32, i32) {
    %c0_i32 = arith.constant 0 : i32
    %c0_i32_0 = arith.constant 0 : i32
    %c0_i32_1 = arith.constant 0 : i32
    return %arg0, %c0_i32, %c0_i32_0 : i32, i32, i32
  }
  func.func @transform_1(%arg0: i32) -> (i32, i32) {
    %c0_i32 = arith.constant 0 : i32
    %c0_i32_0 = arith.constant 0 : i32
    %c0_i32_1 = arith.constant 0 : i32
    return %c0_i32, %c0_i32_0 : i32, i32
  }
  func.func @transform_2(%arg0: i32) -> (i32, i32) {
    %c0_i32 = arith.constant 0 : i32
    %c0_i32_0 = arith.constant 0 : i32
    %c0_i32_1 = arith.constant 0 : i32
    return %c0_i32, %c0_i32_0 : i32, i32
  }
  func.func @transform_3(%arg0: i32) -> (i32, i32) {
    %c0_i32 = arith.constant 0 : i32
    %c0_i32_0 = arith.constant 0 : i32
    %c0_i32_1 = arith.constant 0 : i32
    return %c0_i32, %c0_i32_0 : i32, i32
  }
  func.func @transform_4(%arg0: i32) -> (i32, i32) {
    %c0_i32 = arith.constant 0 : i32
    %c0_i32_0 = arith.constant 0 : i32
    %c0_i32_1 = arith.constant 0 : i32
    return %c0_i32, %c0_i32_0 : i32, i32
  }
  func.func @transform_5(%arg0: i32) -> (i32, i32) {
    %c0_i32 = arith.constant 0 : i32
    %c0_i32_0 = arith.constant 0 : i32
    %c0_i32_1 = arith.constant 0 : i32
    return %c0_i32, %c0_i32_0 : i32, i32
  }
  func.func @transform_6(%arg0: i32) -> (i32, i32) {
    %c0_i32 = arith.constant 0 : i32
    %c0_i32_0 = arith.constant 0 : i32
    %c0_i32_1 = arith.constant 0 : i32
    return %c0_i32, %c0_i32_0 : i32, i32
  }
  func.func @transform_7(%arg0: i32) -> (i32, i32) {
    %c0_i32 = arith.constant 0 : i32
    %c0_i32_0 = arith.constant 0 : i32
    %c0_i32_1 = arith.constant 0 : i32
    return %c0_i32, %c0_i32_0 : i32, i32
  }
  func.func @transform_8(%arg0: i32) -> (i32, i32) {
    %c0_i32 = arith.constant 0 : i32
    %c0_i32_0 = arith.constant 0 : i32
    %c0_i32_1 = arith.constant 0 : i32
    return %c0_i32, %c0_i32_0 : i32, i32
  }
  func.func @transform_9(%arg0: i32) -> (i32, i32) {
    %c0_i32 = arith.constant 0 : i32
    %c0_i32_0 = arith.constant 0 : i32
    %c0_i32_1 = arith.constant 0 : i32
    return %c0_i32, %c0_i32_0 : i32, i32
  }
  func.func @transform_10(%arg0: i32) -> (i32, i32) {
    %c0_i32 = arith.constant 0 : i32
    %c0_i32_0 = arith.constant 0 : i32
    %c0_i32_1 = arith.constant 0 : i32
    return %c0_i32, %c0_i32_0 : i32, i32
  }
  func.func @transform_11(%arg0: i32) -> (i32, i32, i32) {
    %c0_i32 = arith.constant 0 : i32
    %c0_i32_0 = arith.constant 0 : i32
    %c0_i32_1 = arith.constant 0 : i32
    return %arg0, %c0_i32, %c0_i32_0 : i32, i32, i32
  }
}

</mosaic_0001>

<bundles_post_ra>
// kernel: tpu_custom_call.1
= control target key start
LH: loop header
LB: loop body
LE: loop exit
PB: predicated region body
PF: predicated region fallthrough
CT: control target
= control target key end

     0   :  { %s2596_s19 = smov 0   ;;  %s3331_s0 = inlined_call_operand.vmem [shape: f32[2,128,32], index: 0, kind: input, shape index: {}]   ;;  %s3332_s1 = inlined_call_operand.vmem [shape: bf16[96,32], index: 1, kind: input, shape index: {}]   ;;  %s3333_s2 = inlined_call_operand.vmem [shape: f32[1,32], index: 2, kind: input, shape index: {}]   ;;  %s3334_s3 = inlined_call_operand.vmem [shape: f32[1,32], index: 3, kind: input, shape index: {}]   ;;  %s3335_s4 = inlined_call_operand.vmem [shape: f32[1,32], index: 4, kind: input, shape index: {}]   ;;  %s3336_s5 = inlined_call_operand.vmem [shape: bf16[96,32], index: 5, kind: input, shape index: {}]   ;;  %s3337_s6 = inlined_call_operand.vmem [shape: f32[1,32], index: 6, kind: input, shape index: {}]   ;;  %s3338_s7 = inlined_call_operand.vmem [shape: f32[1,32], index: 7, kind: input, shape index: {}]   ;;  %s3339_s8 = inlined_call_operand.vmem [shape: f32[1,32], index: 8, kind: input, shape index: {}]   ;;  %s3340_s9 = inlined_call_operand.vmem [shape: f32[1,32], index: 9, kind: input, shape index: {}]   ;;  %s3341_s10 = inlined_call_operand.<no memory space> [shape: f32[1,1], index: 10, kind: input, shape index: {}]   ;;  %s3342_s11 = inlined_call_operand.vmem [shape: f32[2,128,1], index: 11, kind: output, shape index: {}]  }
   0x1   :  { %v16_v0 = vstv %s3341_s10 }
   0x2   :  { %17 = vst [vmem:[#allocation2] sm:$0x1] %v16_v0 }
   0x3 LB: > { %s2172_s20 = sadd.s32 4294967295, %s2528_s19   ;;  %p2176_p0 = scmp.ge.s32.totalorder %s2528_s19, 1  ;;  %s2528_s19 = sphi %s2596_s19, %s23_s19  }
   0x4   : > { %p339_p1 = scmp.lt.s32.totalorder %s2528_s19, 3 }
   0x6   : > { %p340_p2 = pnand %p2176_p0, %p339_p1 }
   0x7   : > { %p379_p3 = scmp.lt.s32.totalorder (!%p340_p2), %s2172_s20, 1  ;;  %v2476_v1 = vld [vmem:[%s3332_s1] sm:$0xff] (!%p340_p2)   ;;  %v2477_v2 = vld [vmem:[%s3332_s1 + $0x8] sm:$0xff] (!%p340_p2)   ;;  %v2478_v3 = vld [vmem:[%s3332_s1 + $0x10] sm:$0xff] (!%p340_p2)   ;;  %vm455_vm0 = vcmask (!%p340_p2), 1040384   ;;  %vm508_vm1 = vcmask (!%p340_p2), 1046528  }
   0x8   : > { %343 = sbr.rel (%p340_p2) target bundleno = 1266 (0x4f2), region = 64  ;;  %2249 = vmatprep.subr.bf16.mxu0 (!%p340_p2), %v2476_v1  ;;  %v2479_v12 = vld [vmem:[%s3332_s1 + $0x18] sm:$0xff] (!%p340_p2)   ;;  %vm590_vm2 = vcmask (!%p340_p2), 1045504   ;;  %v2480_v22 = vld [vmem:[%s3332_s1 + $0x20] sm:$0xff] (!%p340_p2)   ;;  %s2530_s15 = smov (!%p340_p2), 32   ;;  %v2481_v42 = vld [vmem:[%s3332_s1 + $0x28] sm:$0xff] (!%p340_p2)  }
   0x9   : > { %2250 = vmatpush3.bf16.msra.mxu0 (!%p340_p2), %v2476_v1  ;;  %s2531_s16 = smov (!%p340_p2), 64   ;;  %vm672_vm3 = vcmask (!%p340_p2), 261120   ;;  %vm689_vm4 = vcmask (!%p340_p2), 523264   ;;  %vm769_vm5 = vcmask (!%p340_p2), 785408   ;;  %vm2100_vm6 = vcmask (!%p340_p2), 7168  }
   0xa   : > { %2251 = vmatprep.subr.bf16.mxu0 (!%p340_p2), %v2477_v2 }
   0xd   : > { %2252 = vmatpush3.bf16.msra.mxu0 (!%p340_p2), %v2477_v2  ;;  %v2181_v2 = vld [vmem:[%s3333_s2] ss:$0 sm:$0xff] (!%p340_p2) }
   0xe   : > { %2253 = vmatprep.subr.bf16.mxu0 (!%p340_p2), %v2478_v3 }
   0xf   : > { %s3344_s20 = smov (!%p379_p3, %s2172_s20), 1 }
  0x10   : > { %s2219_s24 = sshll.u32 %s3344_s20, 7 }
  0x11   : > { %s2621_s29 = scalar_lea.vmem %s3331_s0, %s2219_s24  ;;  %2254 = vmatpush3.bf16.msra.mxu0 %v2478_v3  ;;  %s3279_s14 = scalar_lea.vmem %s3342_s11, %s2219_s24 }
  0x12   : > { %v390_v4 = vld [vmem:[%s2621_s29] sm:$0xff]  ;;  %v391_v5 = vld [vmem:[%s2621_s29 + $0x8] sm:$0xff]  ;;  %v392_v6 = vld [vmem:[%s2621_s29 + $0x10] sm:$0xff]  ;;  %2255 = vmatprep.subr.bf16.mxu0 %v2479_v12 }
  0x13   : > { %v456_v7 = vrot.slane %v390_v4, 7  ;;  %v457_v8 = vrot.slane %v391_v5, 7  ;;  %v459_v9 = vrot.slane %v392_v6, 7  ;;  %v393_v10 = vld [vmem:[%s2621_s29 + $0x18] sm:$0xff]  ;;  %v2628_v11 = vld [vmem:[%s2621_s29 + $0x20] sm:$0xff] }
  0x14   : > { %v461_v13 = vrot.slane %v393_v10, 7  ;;  %v463_v14 = vrot.slane %v2628_v11, 7 }
  0x15   : > { %v458_v15 = vsel %vm455_vm0, %v456_v7, %v457_v8  ;;  %v2636_v16 = vsel %vm455_vm0, %v457_v8, %v459_v9  ;;  %v504_v17 = vsel %vm455_vm0, 0.0, %v456_v7  ;;  %2256 = vmatpush3.bf16.msra.mxu0 %v2479_v12 }
  0x16   : > { %v509_v18 = vrot.slane %v504_v17, 1  ;;  %v510_v19 = vrot.slane %v458_v15, 1  ;;  %v512_v20 = vrot.slane %v2636_v16, 1  ;;  %v591_v21 = vrot.slane %v504_v17, 2  ;;  %2257 = vmatprep.subr.bf16.mxu0 %v2480_v22 }
  0x17   : > { %v592_v23 = vrot.slane %v458_v15, 2  ;;  %v594_v24 = vrot.slane %v2636_v16, 2  ;;  %v462_v25 = vsel %vm455_vm0, %v459_v9, %v461_v13  ;;  %v2648_v26 = vsel %vm455_vm0, %v461_v13, %v463_v14 }
  0x18   : > { %v511_v27 = vsel %vm508_vm1, %v509_v18, %v510_v19  ;;  %v513_v28 = vsel %vm508_vm1, %v510_v19, %v512_v20  ;;  %v514_v29 = vrot.slane %v462_v25, 1  ;;  %v516_v30 = vrot.slane %v2648_v26, 1 }
  0x19   : > { %v2316_v31 = vpack.i.bf16 %v513_v28, %v511_v27  ;;  %v593_v32 = vsel %vm590_vm2, %v591_v21, %v592_v23  ;;  %v595_v33 = vsel %vm590_vm2, %v592_v23, %v594_v24  ;;  %v596_v34 = vrot.slane %v462_v25, 2  ;;  %2258 = vmatpush3.bf16.msra.mxu0 %v2480_v22  ;;  %v2483_v27 = vld [vmem:[%s3336_s5 + $0x8] sm:$0xff]  }
  0x1a   : > { %v2326_v35 = vpack.i.bf16 %v595_v33, %v593_v32  ;;  %v515_v36 = vsel %vm508_vm1, %v512_v20, %v514_v29  ;;  %v517_v37 = vsel %vm508_vm1, %v514_v29, %v516_v30  ;;  %v598_v38 = vrot.slane %v2648_v26, 2  ;;  %2259 = vmatprep.subr.bf16.mxu0 %v2481_v42  ;;  %v2485_v32 = vld [vmem:[%s3336_s5 + $0x18] sm:$0xff]  }
  0x1b   : > { %2317 = vrot.lane.b32.xlu0 %v2316_v31, %s2530_s15  ;;  %v2321_v39 = vpack.i.bf16 %v517_v37, %v515_v36  ;;  %v597_v40 = vsel %vm590_vm2, %v594_v24, %v596_v34  ;;  %v2532_v13 = vmov 0.0   ;;  %v2484_v31 = vld [vmem:[%s3336_s5 + $0x10] sm:$0xff]  }
  0x1c   : > { %2327 = vrot.lane.b32.xlu1 %v2326_v35, %s2531_s16  ;;  %v599_v41 = vsel %vm590_vm2, %v596_v34, %v598_v38 }
  0x1d   : > { %v2331_v43 = vpack.i.bf16 %v599_v41, %v597_v40  ;;  %2260 = vmatpush3.bf16.msra.mxu0 %v2481_v42 }
  0x1f   : > { %2322 = vrot.lane.b32.xlu0 %v2321_v39, %s2530_s15 }
  0x20   : > { %2332 = vrot.lane.b32.xlu1 %v2331_v43, %s2531_s16  ;;  %v2196_v43 = vld [vmem:[%s3334_s3] ss:$0 sm:$0xff] }
  0x8d   : > { %v2318_v44 = vpop.permute.xlu0 %2317 }
  0x8e   : > { %v2320_v45 = vunpack.i.h.bf16 %v2318_v44  ;;  %v2319_v46 = vunpack.i.l.bf16 %v2318_v44  ;;  %v2328_v47 = vpop.permute.xlu1 %2327 }
  0x8f   : > { %v2330_v48 = vunpack.i.h.bf16 %v2328_v47  ;;  %v2329_v49 = vunpack.i.l.bf16 %v2328_v47 }
  0x90   : > { %v673_v50 = vsel %vm672_vm3, %v504_v17, %v2319_v46  ;;  %v674_v51 = vsel %vm672_vm3, %v458_v15, %v2320_v45  ;;  %v2687_v15 = vrot.slane %v2532_v13, 7  ;;  %v2197_v45 = vld [vmem:[%s3335_s4] ss:$0 sm:$0xff] }
  0x91   : > { %v2323_v52 = vpop.permute.xlu0 %2322  ;;  %v690_v53 = vsel %vm689_vm4, %v673_v50, %v2329_v49  ;;  %v691_v54 = vsel %vm689_vm4, %v674_v51, %v2330_v48  ;;  %v2486_v46 = vld [vmem:[%s3336_s5 + $0x20] sm:$0xff]   ;;  %v2487_v49 = vld [vmem:[%s3336_s5 + $0x28] sm:$0xff]  }
  0x92   : > { %v2325_v55 = vunpack.i.h.bf16 %v2323_v52  ;;  %v2324_v56 = vunpack.i.l.bf16 %v2323_v52  ;;  %v2333_v57 = vpop.permute.xlu1 %2332  ;;  %v706_v58 = vpack.c.bf16 %v691_v54, %v690_v53  ;;  %v1394_v18 = vrot.slane %v2687_v15, 2 }
  0x93   : > { %v2335_v59 = vunpack.i.h.bf16 %v2333_v57  ;;  %v2334_v60 = vunpack.i.l.bf16 %v2333_v57  ;;  %v1307_v20 = vsel %vm455_vm0, %v2687_v15, 0.0 }
  0x94   : > { %v676_v61 = vsel %vm672_vm3, %v462_v25, %v2325_v55  ;;  %v675_v62 = vsel %vm672_vm3, %v2636_v16, %v2324_v56  ;;  %2261 = vmatprep.mubr.msk.bf16.mxu0 %vm769_vm5, %v706_v58  ;;  %v1313_v16 = vrot.slane %v2687_v15, 1  ;;  %v2695_v19 = vpack.i.bf16 %v1394_v18, %v1394_v18  ;;  %v2482_v25 = vld [vmem:[%s3336_s5] sm:$0xff]  }
  0x95   : > { %v692_v63 = vsel %vm689_vm4, %v675_v62, %v2334_v60  ;;  %v693_v0 = vsel %vm689_vm4, %v676_v61, %v2335_v59  ;;  %v1341_v21 = vrot.slane %v1307_v20, 1  ;;  %v1422_v24 = vrot.slane %v1307_v20, 2  ;;  %2277 = vmatprep.subr.bf16.mxu1 %v2482_v25 }
  0x96   : > { %v707_v1 = vpack.c.bf16 %v693_v0, %v692_v63  ;;  %v2690_v17 = vpack.i.bf16 %v1313_v16, %v1313_v16  ;;  %2278 = vmatpush3.bf16.msra.mxu1 %v2482_v25  ;;  %v395_v63 = vld [vmem:[%s2621_s29 + $0x28] sm:$0xff]  ;;  %v396_v0 = vld [vmem:[%s2621_s29 + $0x30] sm:$0xff] }
  0x97   : > { %v1342_v22 = vsel %vm508_vm1, %v1313_v16, %v1341_v21  ;;  %v1423_v28 = vsel %vm590_vm2, %v1394_v18, %v1422_v24  ;;  %2279 = vmatprep.subr.bf16.mxu1 %v2483_v27 }
  0x98   : > { %2262 = vmatmul.mubr.msk.bf16.vlgmr.msra.gmra.mrb[0].mxu0 %vm769_vm5, %v707_v1  ;;  %v2401_v23 = vpack.i.bf16 %v1342_v22, %v1313_v16  ;;  %v2411_v29 = vpack.i.bf16 %v1423_v28, %v1394_v18  ;;  %v397_v1 = vld [vmem:[%s2621_s29 + $0x38] sm:$0xff] }
  0x99   : > { %v401_v28 = vld [vmem:[%s2621_s29 + $0x58] sm:$0xff] }
  0x9a   : > { %2280 = vmatpush3.bf16.msra.mxu1 %v2483_v27  ;;  %v400_v27 = vld [vmem:[%s2621_s29 + $0x50] sm:$0xff] }
  0x9b   : > { %2281 = vmatprep.subr.bf16.mxu1 %v2484_v31 }
  0x9e   : > { %2282 = vmatpush3.bf16.msra.mxu1 %v2484_v31 }
  0x9f   : > { %2283 = vmatprep.subr.bf16.mxu1 %v2485_v32 }
  0xa2   : > { %2284 = vmatpush3.bf16.msra.mxu1 %v2485_v32 }
  0xa3   : > { %2285 = vmatprep.subr.bf16.mxu1 %v2486_v46 }
  0xa6   : > { %2286 = vmatpush3.bf16.msra.mxu1 %v2486_v46  ;;  %v405_v46 = vld [vmem:[%s2621_s29 + $0x78] sm:$0xff] }
  0xa7   : > { %2287 = vmatprep.subr.bf16.mxu1 %v2487_v49 }
  0xaa   : > { %2288 = vmatpush3.bf16.msra.mxu1 %v2487_v49 }
 0x16b   : > { %v2263_v3 = vpop.f32.mrb[0].mxu0 }
 0x16c   : > { %v828_v4 = vpop.f32.mrb[1].mxu0  ;;  %v467_v3 = vrot.slane %v396_v0, 7 }
 0x16d   : > { %v829_v5 = vadd.f32 %v2181_v2, %v828_v4  ;;  %v2264_v6 = vpop.f32.mrb[2].mxu0  ;;  %v465_v2 = vrot.slane %v395_v63, 7  ;;  %v398_v4 = vld [vmem:[%s2621_s29 + $0x40] sm:$0xff] }
 0x16e   : > { %v831_v7 = vpop.f32.mrb[3].mxu0  ;;  %v399_v6 = vld [vmem:[%s2621_s29 + $0x48] sm:$0xff] }
 0x16f   : > { %v891_v8 = vmax.f32 %v829_v5, 0.0  ;;  %v469_v5 = vrot.slane %v397_v1, 7  ;;  %v471_v7 = vrot.slane %v398_v4, 7 }
 0x171   : > { %v907_v9 = vsel %vm672_vm3, %v891_v8, 0.0  ;;  %v972_v10 = vmul.f32 %v891_v8, %v891_v8 }
 0x172   : > { %908 = vadd.xlane.f32.xlu0 %v907_v9  ;;  %v2775_v9 = vsel %vm455_vm0, %v465_v2, %v467_v3 }
 0x173   : > { %v988_v12 = vsel %vm672_vm3, %v972_v10, 0.0  ;;  %v2778_v10 = vsel %vm455_vm0, %v467_v3, %v469_v5  ;;  %v602_v20 = vrot.slane %v2775_v9, 2 }
 0x174   : > { %989 = vadd.xlane.f32.xlu1 %v988_v12  ;;  %v473_v12 = vrot.slane %v399_v6, 7  ;;  %v522_v11 = vrot.slane %v2778_v10, 1  ;;  %v604_v21 = vrot.slane %v2778_v10, 2 }
 0x185   : > { %2337 = vrot.lane.b32.xlu1 %v2690_v17, %s2530_s15 }
 0x189   : > { %2342 = vrot.lane.b32.xlu1 %v2695_v19, %s2531_s16 }
 0x18d   : > { %2362 = vrot.lane.b32.xlu1 %v2690_v17, %s2530_s15 }
 0x191   : > { %2372 = vrot.lane.b32.xlu1 %v2695_v19, %s2531_s16 }
 0x195   : > { %2382 = vrot.lane.b32.xlu1 %v2690_v17, %s2530_s15 }
 0x199   : > { %2392 = vrot.lane.b32.xlu1 %v2695_v19, %s2531_s16 }
 0x19d   : > { %2402 = vrot.lane.b32.xlu1 %v2401_v23, %s2530_s15 }
 0x1a1   : > { %2412 = vrot.lane.b32.xlu1 %v2411_v29, %s2531_s16 }
 0x1ff   : > { %v909_v33 = vpop.xlane.xlu0 %908 }
 0x200   : > { %v956_v34 = vmul.f32 0.03125, %v909_v33  ;;  %v402_v33 = vld [vmem:[%s2621_s29 + $0x60] sm:$0xff] }
 0x201   : > { %v990_v35 = vpop.xlane.xlu1 %989 }
 0x202   : > { %v1052_v36 = vmul.f32 %v956_v34, %v956_v34  ;;  %v1036_v37 = vmul.f32 0.03125, %v990_v35  ;;  %v1116_v41 = vsub.f32 %v891_v8, %v956_v34  ;;  %v2772_v8 = vsel %vm455_vm0, %v463_v14, %v465_v2  ;;  %v403_v34 = vld [vmem:[%s2621_s29 + $0x68] sm:$0xff] }
 0x203   : > { %v518_v13 = vrot.slane %v2772_v8, 1 }
 0x204   : > { %v1068_v39 = vsub.f32 %v1036_v37, %v1052_v36  ;;  %v605_v36 = vsel %vm590_vm2, %v602_v20, %v604_v21 }
 0x205   : > { %v519_v22 = vsel %vm508_vm1, %v516_v30, %v518_v13 }
 0x206   : > { %v1084_v40 = vadd.f32 1e-05, %v1068_v39  ;;  %v404_v39 = vld [vmem:[%s2621_s29 + $0x70] sm:$0xff] }
 0x208   : > { %2488 = vrsqrt.f32 %v1084_v40 }
 0x212   : > { %v2489_v42 = vpop.eup %2488 }
 0x213   : > { %v1132_v44 = vmul.f32 %v2489_v42, %v1116_v41  ;;  %v475_v41 = vrot.slane %v400_v27, 7  ;;  %v477_v42 = vrot.slane %v401_v28, 7 }
 0x215   : > { %v1155_v47 = vmul.f32 %v2196_v43, %v1132_v44  ;;  %v479_v44 = vrot.slane %v402_v33, 7 }
 0x217   : > { %v1178_v48 = vadd.f32 %v2197_v45, %v1155_v47  ;;  %v481_v45 = vrot.slane %v403_v34, 7  ;;  %v2818_v47 = vsel %vm455_vm0, %v473_v12, %v475_v41 }
 0x219   : > { %v1258_v50 = vrot.slane %v1178_v48, 7  ;;  %v2821_v48 = vsel %vm455_vm0, %v475_v41, %v477_v42  ;;  %v2838_v0 = vsel %vm455_vm0, %v479_v44, %v481_v45  ;;  %v2338_v41 = vpop.permute.xlu1 %2337 }
 0x21b   : > { %v2739_v51 = vsel %vm455_vm0, %v1258_v50, %v2687_v15  ;;  %v2742_v52 = vsel %vm455_vm0, 0.0, %v1258_v50  ;;  %v483_v50 = vrot.slane %v404_v39, 7 }
 0x21c   : > { %v1310_v53 = vrot.slane %v2742_v52, 1  ;;  %v1311_v54 = vrot.slane %v2739_v51, 1  ;;  %v1391_v55 = vrot.slane %v2742_v52, 2  ;;  %v1392_v56 = vrot.slane %v2739_v51, 2 }
 0x21e   : > { %v1312_v57 = vsel %vm508_vm1, %v1310_v53, %v1311_v54  ;;  %v1314_v58 = vsel %vm508_vm1, %v1311_v54, %v1313_v16  ;;  %v1393_v60 = vsel %vm590_vm2, %v1391_v55, %v1392_v56  ;;  %v1395_v61 = vsel %vm590_vm2, %v1392_v56, %v1394_v18 }
 0x21f   : > { %v2346_v59 = vpack.i.bf16 %v1314_v58, %v1312_v57  ;;  %v2351_v62 = vpack.i.bf16 %v1395_v61, %v1393_v60  ;;  %v520_v16 = vrot.slane %v2775_v9, 1  ;;  %v600_v18 = vrot.slane %v2772_v8, 2 }
 0x220   : > { %v528_v54 = vrot.slane %v2818_v47, 1  ;;  %v2827_v55 = vsel %vm455_vm0, %v477_v42, %v479_v44  ;;  %v530_v56 = vrot.slane %v2821_v48, 1  ;;  %v610_v58 = vrot.slane %v2818_v47, 2  ;;  %v2343_v42 = vpop.permute.xlu1 %2342 }
 0x221   : > { %2347 = vrot.lane.b32.xlu0 %v2346_v59, %s2530_s15  ;;  %v521_v23 = vsel %vm508_vm1, %v518_v13, %v520_v16  ;;  %v523_v24 = vsel %vm508_vm1, %v520_v16, %v522_v11  ;;  %v601_v32 = vsel %vm590_vm2, %v598_v38, %v600_v18  ;;  %v603_v30 = vsel %vm590_vm2, %v600_v18, %v602_v20 }
 0x222   : > { %v2416_v29 = vpack.i.bf16 %v521_v23, %v519_v22  ;;  %v2426_v40 = vpack.i.bf16 %v603_v30, %v601_v32  ;;  %v532_v57 = vrot.slane %v2827_v55, 1  ;;  %v612_v59 = vrot.slane %v2821_v48, 2 }
 0x223   : > { %v485_v60 = vrot.slane %v405_v46, 7  ;;  %v614_v63 = vrot.slane %v2827_v55, 2  ;;  %v534_v13 = vrot.slane %v2838_v0, 1  ;;  %v2339_v44 = vunpack.i.l.bf16 %v2338_v41 }
 0x224   : > { %v533_v2 = vsel %vm508_vm1, %v530_v56, %v532_v57  ;;  %v613_v4 = vsel %vm590_vm2, %v610_v58, %v612_v59  ;;  %v2345_v46 = vunpack.i.h.bf16 %v2343_v42 }
 0x225   : > { %2352 = vrot.lane.b32.xlu0 %v2351_v62, %s2531_s16  ;;  %v531_v62 = vsel %vm508_vm1, %v528_v54, %v530_v56  ;;  %v505_v18 = vsel %vm455_vm0, %v485_v60, 0.0 }
 0x226   : > { %v540_v22 = vrot.slane %v505_v18, 1  ;;  %v622_v32 = vrot.slane %v505_v18, 2 }
 0x229   : > { %2357 = vrot.lane.b32.xlu0 %v2690_v17, %s2530_s15 }
 0x22d   : > { %2367 = vrot.lane.b32.xlu0 %v2695_v19, %s2531_s16 }
 0x231   : > { %2377 = vrot.lane.b32.xlu0 %v2690_v17, %s2530_s15 }
 0x235   : > { %2387 = vrot.lane.b32.xlu0 %v2695_v19, %s2531_s16 }
 0x239   : > { %2397 = vrot.lane.b32.xlu0 %v2690_v17, %s2530_s15  ;;  %v2783_v17 = vsel %vm455_vm0, %v469_v5, %v471_v7  ;;  %v2441_v5 = vpack.i.bf16 %v533_v2, %v531_v62 }
 0x23a   : > { %v524_v14 = vrot.slane %v2783_v17, 1  ;;  %v606_v25 = vrot.slane %v2783_v17, 2 }
 0x23c   : > { %v525_v31 = vsel %vm508_vm1, %v522_v11, %v524_v14  ;;  %v607_v37 = vsel %vm590_vm2, %v604_v21, %v606_v25  ;;  %v2852_v11 = vsel %vm455_vm0, %v483_v50, %v485_v60 }
 0x23d   : > { %2407 = vrot.lane.b32.xlu0 %v2695_v19, %s2531_s16  ;;  %v2421_v35 = vpack.i.bf16 %v525_v31, %v523_v24  ;;  %v2811_v19 = vsel %vm455_vm0, %v471_v7, %v473_v12  ;;  %v2431_v38 = vpack.i.bf16 %v607_v37, %v605_v36  ;;  %v615_v7 = vsel %vm590_vm2, %v612_v59, %v614_v63 }
 0x23e   : > { %v526_v43 = vrot.slane %v2811_v19, 1  ;;  %v608_v49 = vrot.slane %v2811_v19, 2  ;;  %v2847_v12 = vsel %vm455_vm0, %v481_v45, %v483_v50  ;;  %v538_v20 = vrot.slane %v2852_v11, 1 }
 0x23f   : > { %2422 = vrot.lane.b32.xlu1 %v2421_v35, %s2530_s15  ;;  %v536_v16 = vrot.slane %v2847_v12, 1  ;;  %v618_v23 = vrot.slane %v2847_v12, 2  ;;  %v620_v24 = vrot.slane %v2852_v11, 2 }
 0x240   : > { %v527_v53 = vsel %vm508_vm1, %v524_v14, %v526_v43  ;;  %v529_v61 = vsel %vm508_vm1, %v526_v43, %v528_v54  ;;  %v609_v3 = vsel %vm590_vm2, %v606_v25, %v608_v49  ;;  %v611_v6 = vsel %vm590_vm2, %v608_v49, %v610_v58 }
 0x241   : > { %2417 = vrot.lane.b32.xlu0 %v2416_v29, %s2530_s15  ;;  %v2436_v1 = vpack.i.bf16 %v529_v61, %v527_v53  ;;  %v2451_v14 = vpack.i.bf16 %v615_v7, %v613_v4  ;;  %v2446_v21 = vpack.i.bf16 %v611_v6, %v609_v3  ;;  %v535_v25 = vsel %vm508_vm1, %v532_v57, %v534_v13 }
 0x242   : > { %v537_v27 = vsel %vm508_vm1, %v534_v13, %v536_v16  ;;  %v539_v28 = vsel %vm508_vm1, %v536_v16, %v538_v20  ;;  %v616_v29 = vrot.slane %v2838_v0, 2  ;;  %v541_v31 = vsel %vm508_vm1, %v538_v20, %v540_v22 }
 0x243   : > { %2432 = vrot.lane.b32.xlu1 %v2431_v38, %s2531_s16  ;;  %v2461_v30 = vpack.i.bf16 %v541_v31, %v539_v28  ;;  %v2456_v33 = vpack.i.bf16 %v537_v27, %v535_v25  ;;  %v621_v34 = vsel %vm590_vm2, %v618_v23, %v620_v24  ;;  %v623_v35 = vsel %vm590_vm2, %v620_v24, %v622_v32  ;;  %v2363_v38 = vpop.permute.xlu1 %2362 }
 0x244   : > { %v617_v36 = vsel %vm590_vm2, %v614_v63, %v616_v29  ;;  %v619_v37 = vsel %vm590_vm2, %v616_v29, %v618_v23  ;;  %v2471_v39 = vpack.i.bf16 %v623_v35, %v621_v34  ;;  %v2340_v43 = vunpack.i.h.bf16 %v2338_v41 }
 0x245   : > { %2427 = vrot.lane.b32.xlu0 %v2426_v40, %s2531_s16  ;;  %v2466_v40 = vpack.i.bf16 %v619_v37, %v617_v36  ;;  %v2344_v49 = vunpack.i.l.bf16 %v2343_v42  ;;  %v1474_v53 = vsel %vm672_vm3, %v2687_v15, %v2339_v44  ;;  %v2365_v63 = vunpack.i.h.bf16 %v2363_v38 }
 0x246   : > { %v1475_v50 = vsel %vm672_vm3, %v2687_v15, %v2340_v43 }
 0x247   : > { %2442 = vrot.lane.b32.xlu1 %v2441_v5, %s2530_s15  ;;  %v2373_v54 = vpop.permute.xlu1 %2372  ;;  %v1490_v58 = vsel %vm689_vm4, %v1474_v53, %v2344_v49  ;;  %v1491_v59 = vsel %vm689_vm4, %v1475_v50, %v2345_v46  ;;  %v1479_v22 = vsel %vm672_vm3, %v2687_v15, %v2365_v63 }
 0x248   : > { %v1505_v7 = vpack.c.bf16 %v1491_v59, %v1490_v58  ;;  %v2374_v18 = vunpack.i.l.bf16 %v2373_v54 }
 0x249   : > { %2437 = vrot.lane.b32.xlu0 %v2436_v1, %s2530_s15  ;;  %v2364_v1 = vunpack.i.l.bf16 %v2363_v38 }
 0x24b   : > { %2452 = vrot.lane.b32.xlu1 %v2451_v14, %s2531_s16  ;;  %v2383_v2 = vpop.permute.xlu1 %2382  ;;  %v2375_v14 = vunpack.i.h.bf16 %v2373_v54 }
 0x24c   : > { %v2385_v32 = vunpack.i.h.bf16 %v2383_v2 }
 0x24d   : > { %2447 = vrot.lane.b32.xlu0 %v2446_v21, %s2531_s16  ;;  %v1495_v28 = vsel %vm689_vm4, %v1479_v22, %v2375_v14 }
 0x24e   : > { %v1483_v43 = vsel %vm672_vm3, %v2687_v15, %v2385_v32 }
 0x24f   : > { %2462 = vrot.lane.b32.xlu1 %v2461_v30, %s2530_s15  ;;  %v2384_v30 = vunpack.i.l.bf16 %v2383_v2 }
 0x251   : > { %2457 = vrot.lane.b32.xlu0 %v2456_v33, %s2530_s15  ;;  %v1482_v44 = vsel %vm672_vm3, %v2687_v15, %v2384_v30 }
 0x253   : > { %2472 = vrot.lane.b32.xlu1 %v2471_v39, %s2531_s16 }
 0x255   : > { %2467 = vrot.lane.b32.xlu0 %v2466_v40, %s2531_s16 }
 0x293   : > { %v2348_v45 = vpop.permute.xlu0 %2347 }
 0x294   : > { %v2350_v56 = vunpack.i.h.bf16 %v2348_v45  ;;  %v2349_v57 = vunpack.i.l.bf16 %v2348_v45 }
 0x296   : > { %v1472_v3 = vsel %vm672_vm3, %v2742_v52, %v2349_v57  ;;  %v1473_v4 = vsel %vm672_vm3, %v2739_v51, %v2350_v56  ;;  %v1478_v52 = vsel %vm672_vm3, %v2687_v15, %v2364_v1  ;;  %v2393_v51 = vpop.permute.xlu1 %2392 }
 0x297   : > { %v2353_v60 = vpop.permute.xlu0 %2352  ;;  %v1494_v27 = vsel %vm689_vm4, %v1478_v52, %v2374_v18  ;;  %v2395_v40 = vunpack.i.h.bf16 %v2393_v51  ;;  %v2394_v41 = vunpack.i.l.bf16 %v2393_v51 }
 0x298   : > { %v2355_v61 = vunpack.i.h.bf16 %v2353_v60  ;;  %v2354_v62 = vunpack.i.l.bf16 %v2353_v60  ;;  %v1507_v35 = vpack.c.bf16 %v1495_v28, %v1494_v27 }
 0x299   : > { %v1498_v50 = vsel %vm689_vm4, %v1482_v44, %v2394_v41  ;;  %v1499_v53 = vsel %vm689_vm4, %v1483_v43, %v2395_v40 }
 0x29a   : > { %v1488_v5 = vsel %vm689_vm4, %v1472_v3, %v2354_v62  ;;  %v1489_v6 = vsel %vm689_vm4, %v1473_v4, %v2355_v61  ;;  %v2403_v36 = vpop.permute.xlu1 %2402  ;;  %v1509_v62 = vpack.c.bf16 %v1499_v53, %v1498_v50 }
 0x29b   : > { %v1504_v13 = vpack.c.bf16 %v1489_v6, %v1488_v5  ;;  %v2358_v16 = vpop.permute.xlu0 %2357  ;;  %v2405_v57 = vunpack.i.h.bf16 %v2403_v36  ;;  %v2404_v58 = vunpack.i.l.bf16 %v2403_v36 }
 0x29c   : > { %v2360_v20 = vunpack.i.h.bf16 %v2358_v16  ;;  %v2359_v21 = vunpack.i.l.bf16 %v2358_v16 }
 0x29d   : > { %2289 = vmatprep.mubr.msk.bf16.mxu1 %vm769_vm5, %v1504_v13  ;;  %v1487_v6 = vsel %vm672_vm3, %v2687_v15, %v2405_v57 }
 0x29e   : > { %2290 = vmatmul.mubr.msk.bf16.vlgmr.msra.gmra.mrb[0].mxu1 %vm769_vm5, %v1505_v7  ;;  %v1477_v23 = vsel %vm672_vm3, %v2687_v15, %v2360_v20  ;;  %v1476_v24 = vsel %vm672_vm3, %v2687_v15, %v2359_v21  ;;  %v2413_v59 = vpop.permute.xlu1 %2412  ;;  %v1486_v7 = vsel %vm672_vm3, %v2687_v15, %v2404_v58 }
 0x29f   : > { %v2368_v25 = vpop.permute.xlu0 %2367  ;;  %v2415_v2 = vunpack.i.h.bf16 %v2413_v59  ;;  %v2414_v3 = vunpack.i.l.bf16 %v2413_v59 }
 0x2a0   : > { %v2370_v29 = vunpack.i.h.bf16 %v2368_v25  ;;  %v2369_v31 = vunpack.i.l.bf16 %v2368_v25 }
 0x2a1   : > { %v1502_v18 = vsel %vm689_vm4, %v1486_v7, %v2414_v3  ;;  %v1503_v20 = vsel %vm689_vm4, %v1487_v6, %v2415_v2 }
 0x2a2   : > { %v1492_v33 = vsel %vm689_vm4, %v1476_v24, %v2369_v31  ;;  %v1493_v34 = vsel %vm689_vm4, %v1477_v23, %v2370_v29  ;;  %v1511_v23 = vpack.c.bf16 %v1503_v20, %v1502_v18 }
 0x2a3   : > { %v1506_v37 = vpack.c.bf16 %v1493_v34, %v1492_v33  ;;  %v2378_v39 = vpop.permute.xlu0 %2377 }
 0x2a4   : > { %v2380_v42 = vunpack.i.h.bf16 %v2378_v39  ;;  %v2379_v38 = vunpack.i.l.bf16 %v2378_v39 }
 0x2a5   : > { %2293 = vmatprep.mubr.msk.bf16.mxu1 %vm769_vm5, %v1506_v37 }
 0x2a6   : > { %2294 = vmatmul.mubr.msk.bf16.gmra.mrb[4].mxu1 %vm769_vm5, %v1507_v35  ;;  %v1481_v45 = vsel %vm672_vm3, %v2687_v15, %v2380_v42  ;;  %v1480_v46 = vsel %vm672_vm3, %v2687_v15, %v2379_v38 }
 0x2a7   : > { %v2388_v49 = vpop.permute.xlu0 %2387 }
 0x2a8   : > { %v2390_v54 = vunpack.i.h.bf16 %v2388_v49  ;;  %v2389_v56 = vunpack.i.l.bf16 %v2388_v49 }
 0x2aa   : > { %v1496_v60 = vsel %vm689_vm4, %v1480_v46, %v2389_v56  ;;  %v1497_v61 = vsel %vm689_vm4, %v1481_v45, %v2390_v54 }
 0x2ab   : > { %v1508_v63 = vpack.c.bf16 %v1497_v61, %v1496_v60  ;;  %v2398_v1 = vpop.permute.xlu0 %2397 }
 0x2ac   : > { %v2400_v4 = vunpack.i.h.bf16 %v2398_v1  ;;  %v2399_v5 = vunpack.i.l.bf16 %v2398_v1 }
 0x2ad   : > { %2297 = vmatprep.mubr.msk.bf16.mxu1 %vm769_vm5, %v1508_v63 }
 0x2ae   : > { %2298 = vmatmul.mubr.msk.bf16.gmra.mrb[8].mxu1 %vm769_vm5, %v1509_v62  ;;  %v1485_v13 = vsel %vm672_vm3, %v2687_v15, %v2400_v4  ;;  %v1484_v16 = vsel %vm672_vm3, %v2687_v15, %v2399_v5 }
 0x2af   : > { %v2408_v14 = vpop.permute.xlu0 %2407 }
 0x2b0   : > { %v2410_v21 = vunpack.i.h.bf16 %v2408_v14  ;;  %v2409_v22 = vunpack.i.l.bf16 %v2408_v14 }
 0x2b1   : > { %v2423_v27 = vpop.permute.xlu1 %2422 }
 0x2b2   : > { %v1500_v52 = vsel %vm689_vm4, %v1484_v16, %v2409_v22  ;;  %v1501_v51 = vsel %vm689_vm4, %v1485_v13, %v2410_v21  ;;  %v2425_v29 = vunpack.i.h.bf16 %v2423_v27  ;;  %v2424_v31 = vunpack.i.l.bf16 %v2423_v27 }
 0x2b3   : > { %v1510_v24 = vpack.c.bf16 %v1501_v51, %v1500_v52  ;;  %v2418_v25 = vpop.permute.xlu0 %2417 }
 0x2b4   : > { %v2420_v15 = vunpack.i.h.bf16 %v2418_v25  ;;  %v2419_v28 = vunpack.i.l.bf16 %v2418_v25  ;;  %v680_v33 = vsel %vm672_vm3, %v2778_v10, %v2425_v29  ;;  %v679_v34 = vsel %vm672_vm3, %v2775_v9, %v2424_v31 }
 0x2b5   : > { %2301 = vmatprep.mubr.msk.bf16.mxu1 %vm769_vm5, %v1510_v24  ;;  %v2433_v36 = vpop.permute.xlu1 %2432 }
 0x2b6   : > { %2302 = vmatmul.mubr.msk.bf16.gmra.mrb[12].mxu1 %vm769_vm5, %v1511_v23  ;;  %v678_v32 = vsel %vm672_vm3, %v2772_v8, %v2420_v15  ;;  %v677_v30 = vsel %vm672_vm3, %v2648_v26, %v2419_v28  ;;  %v2435_v40 = vunpack.i.h.bf16 %v2433_v36  ;;  %v2434_v41 = vunpack.i.l.bf16 %v2433_v36 }
 0x2b7   : > { %v2428_v35 = vpop.permute.xlu0 %2427 }
 0x2b8   : > { %v2430_v37 = vunpack.i.h.bf16 %v2428_v35  ;;  %v2429_v39 = vunpack.i.l.bf16 %v2428_v35  ;;  %v696_v8 = vsel %vm689_vm4, %v679_v34, %v2434_v41  ;;  %v697_v26 = vsel %vm689_vm4, %v680_v33, %v2435_v40 }
 0x2b9   : > { %v709_v44 = vpack.c.bf16 %v697_v26, %v696_v8  ;;  %v2443_v45 = vpop.permute.xlu1 %2442 }
 0x2ba   : > { %v694_v42 = vsel %vm689_vm4, %v677_v30, %v2429_v39  ;;  %v695_v38 = vsel %vm689_vm4, %v678_v32, %v2430_v37  ;;  %v2445_v49 = vunpack.i.h.bf16 %v2443_v45  ;;  %v2444_v50 = vunpack.i.l.bf16 %v2443_v45 }
 0x2bb   : > { %v708_v43 = vpack.c.bf16 %v695_v38, %v694_v42  ;;  %v2438_v10 = vpop.permute.xlu0 %2437 }
 0x2bc   : > { %v2440_v46 = vunpack.i.h.bf16 %v2438_v10  ;;  %v2439_v9 = vunpack.i.l.bf16 %v2438_v10  ;;  %v684_v56 = vsel %vm672_vm3, %v2821_v48, %v2445_v49  ;;  %v683_v57 = vsel %vm672_vm3, %v2818_v47, %v2444_v50 }
 0x2bd   : > { %2265 = vmatprep.mubr.msk.bf16.mxu0 %vm769_vm5, %v708_v43  ;;  %v2453_v59 = vpop.permute.xlu1 %2452 }
 0x2be   : > { %2266 = vmatmul.mubr.msk.bf16.gmra.mrb[4].mxu0 %vm769_vm5, %v709_v44  ;;  %v682_v53 = vsel %vm672_vm3, %v2811_v19, %v2440_v46  ;;  %v681_v54 = vsel %vm672_vm3, %v2783_v17, %v2439_v9  ;;  %v2455_v62 = vunpack.i.h.bf16 %v2453_v59  ;;  %v2454_v63 = vunpack.i.l.bf16 %v2453_v59 }
 0x2bf   : > { %v2448_v58 = vpop.permute.xlu0 %2447 }
 0x2c0   : > { %v2450_v60 = vunpack.i.h.bf16 %v2448_v58  ;;  %v2449_v61 = vunpack.i.l.bf16 %v2448_v58  ;;  %v700_v19 = vsel %vm689_vm4, %v683_v57, %v2454_v63  ;;  %v701_v17 = vsel %vm689_vm4, %v684_v56, %v2455_v62 }
 0x2c1   : > { %v711_v4 = vpack.c.bf16 %v701_v17, %v700_v19  ;;  %v2463_v5 = vpop.permute.xlu1 %2462 }
 0x2c2   : > { %v698_v1 = vsel %vm689_vm4, %v681_v54, %v2449_v61  ;;  %v699_v2 = vsel %vm689_vm4, %v682_v53, %v2450_v60  ;;  %v2465_v7 = vunpack.i.h.bf16 %v2463_v5  ;;  %v2464_v13 = vunpack.i.l.bf16 %v2463_v5 }
 0x2c3   : > { %v710_v3 = vpack.c.bf16 %v699_v2, %v698_v1  ;;  %v2458_v48 = vpop.permute.xlu0 %2457 }
 0x2c4   : > { %v2460_v6 = vunpack.i.h.bf16 %v2458_v48  ;;  %v2459_v47 = vunpack.i.l.bf16 %v2458_v48  ;;  %v688_v18 = vsel %vm672_vm3, %v2852_v11, %v2465_v7  ;;  %v687_v20 = vsel %vm672_vm3, %v2847_v12, %v2464_v13  ;;  %v2976_v12 = vld [vmem:[%s3337_s6] ss:$0 sm:$0xff] }
 0x2c5   : > { %2269 = vmatprep.mubr.msk.bf16.mxu0 %vm769_vm5, %v710_v3  ;;  %v2473_v22 = vpop.permute.xlu1 %2472 }
 0x2c6   : > { %2270 = vmatmul.mubr.msk.bf16.gmra.mrb[8].mxu0 %vm769_vm5, %v711_v4  ;;  %v686_v16 = vsel %vm672_vm3, %v2838_v0, %v2460_v6  ;;  %v685_v14 = vsel %vm672_vm3, %v2827_v55, %v2459_v47  ;;  %v2475_v23 = vunpack.i.h.bf16 %v2473_v22  ;;  %v2474_v24 = vunpack.i.l.bf16 %v2473_v22 }
 0x2c7   : > { %v2468_v21 = vpop.permute.xlu0 %2467 }
 0x2c8   : > { %v2470_v52 = vunpack.i.h.bf16 %v2468_v21  ;;  %v2469_v51 = vunpack.i.l.bf16 %v2468_v21  ;;  %v704_v0 = vsel %vm689_vm4, %v687_v20, %v2474_v24  ;;  %v705_v55 = vsel %vm689_vm4, %v688_v18, %v2475_v23 }
 0x2c9   : > { %v713_v28 = vpack.c.bf16 %v705_v55, %v704_v0 }
 0x2ca   : > { %v702_v25 = vsel %vm689_vm4, %v685_v14, %v2469_v51  ;;  %v703_v27 = vsel %vm689_vm4, %v686_v16, %v2470_v52 }
 0x2cb   : > { %v712_v15 = vpack.c.bf16 %v703_v27, %v702_v25 }
 0x2cd   : > { %2273 = vmatprep.mubr.msk.bf16.mxu0 %vm769_vm5, %v712_v15 }
 0x2ce   : > { %2274 = vmatmul.mubr.msk.bf16.gmra.mrb[12].mxu0 %vm769_vm5, %v713_v28 }
 0x371   : > { %v2291_v11 = vpop.f32.mrb[0].mxu1 }
 0x372   : > { %v1634_v29 = vadd.f32 %v2291_v11, %v2976_v12  ;;  %v1625_v31 = vpop.f32.mrb[1].mxu1 }
 0x373   : > { %v1626_v32 = vadd.f32 %v2976_v12, %v1625_v31  ;;  %v2292_v30 = vpop.f32.mrb[2].mxu1 }
 0x374   : > { %v2980_v33 = vmax.f32 %v1634_v29, 0.0  ;;  %v1628_v34 = vpop.f32.mrb[3].mxu1  ;;  %v1637_v37 = vadd.f32 %v2292_v30, %v2976_v12 }
 0x375   : > { %v1629_v35 = vadd.f32 %v2976_v12, %v1628_v34  ;;  %v2983_v36 = vmax.f32 %v1626_v32, 0.0 }
 0x376   : > { %v1710_v39 = vsel %vm672_vm3, %v2980_v33, 0.0  ;;  %v1770_v40 = vmul.f32 %v2980_v33, %v2980_v33  ;;  %v2993_v8 = vmax.f32 %v1637_v37, 0.0 }
 0x377   : > { %1711 = vadd.xlane.f32.xlu0 %v1710_v39  ;;  %v2990_v41 = vmax.f32 %v1629_v35, 0.0  ;;  %v1704_v26 = vsel %vm672_vm3, %v2983_v36, 0.0  ;;  %v1768_v9 = vmul.f32 %v2983_v36, %v2983_v36 }
 0x378   : > { %v1790_v42 = vsel %vm672_vm3, %v1770_v40, 0.0  ;;  %v1713_v50 = vsel %vm672_vm3, %v2993_v8, 0.0  ;;  %v1771_v53 = vmul.f32 %v2993_v8, %v2993_v8 }
 0x379   : > { %1791 = vadd.xlane.f32.xlu1 %v1790_v42  ;;  %v2295_v38 = vpop.f32.mrb[4].mxu1  ;;  %v1707_v45 = vsel %vm672_vm3, %v2990_v41, 0.0  ;;  %v1784_v56 = vsel %vm672_vm3, %v1768_v9, 0.0  ;;  %v1769_v61 = vmul.f32 %v2990_v41, %v2990_v41 }
 0x37a   : > { %v1650_v43 = vadd.f32 %v2295_v38, %v2976_v12  ;;  %v1641_v44 = vpop.f32.mrb[5].mxu1  ;;  %v1793_v59 = vsel %vm672_vm3, %v1771_v53, 0.0 }
 0x37b   : > { %1705 = vadd.xlane.f32.xlu0 %v1704_v26  ;;  %v2296_v10 = vpop.f32.mrb[6].mxu1  ;;  %v1642_v54 = vadd.f32 %v2976_v12, %v1641_v44  ;;  %v1787_v3 = vsel %vm672_vm3, %v1769_v61, 0.0 }
 0x37c   : > { %v1644_v46 = vpop.f32.mrb[7].mxu1  ;;  %v3002_v49 = vmax.f32 %v1650_v43, 0.0  ;;  %v1653_v58 = vadd.f32 %v2296_v10, %v2976_v12 }
 0x37d   : > { %1708 = vadd.xlane.f32.xlu1 %v1707_v45  ;;  %v3016_v1 = vmax.f32 %v1642_v54, 0.0  ;;  %v1645_v17 = vadd.f32 %v2976_v12, %v1644_v46 }
 0x37e   : > { %v1722_v60 = vsel %vm672_vm3, %v3002_v49, 0.0  ;;  %v3018_v19 = vmax.f32 %v1653_v58, 0.0  ;;  %v1774_v48 = vmul.f32 %v3002_v49, %v3002_v49 }
 0x37f   : > { %1714 = vadd.xlane.f32.xlu0 %v1713_v50  ;;  %v1716_v4 = vsel %vm672_vm3, %v3016_v1, 0.0  ;;  %v3026_v6 = vmax.f32 %v1645_v17, 0.0  ;;  %v1772_v18 = vmul.f32 %v3016_v1, %v3016_v1 }
 0x380   : > { %v1725_v47 = vsel %vm672_vm3, %v3018_v19, 0.0  ;;  %v1802_v14 = vsel %vm672_vm3, %v1774_v48, 0.0  ;;  %v1775_v52 = vmul.f32 %v3018_v19, %v3018_v19 }
 0x381   : > { %1785 = vadd.xlane.f32.xlu1 %v1784_v56  ;;  %v2299_v57 = vpop.f32.mrb[8].mxu1  ;;  %v1719_v22 = vsel %vm672_vm3, %v3026_v6, 0.0  ;;  %v1796_v23 = vsel %vm672_vm3, %v1772_v18, 0.0  ;;  %v1773_v0 = vmul.f32 %v3026_v6, %v3026_v6 }
 0x382   : > { %v1657_v62 = vpop.f32.mrb[9].mxu1  ;;  %v1666_v7 = vadd.f32 %v2299_v57, %v2976_v12  ;;  %v1805_v25 = vsel %vm672_vm3, %v1775_v52, 0.0 }
 0x383   : > { %1794 = vadd.xlane.f32.xlu0 %v1793_v59  ;;  %v2300_v63 = vpop.f32.mrb[10].mxu1  ;;  %v1658_v51 = vadd.f32 %v2976_v12, %v1657_v62  ;;  %v1799_v11 = vsel %vm672_vm3, %v1773_v0, 0.0 }
 0x384   : > { %v1660_v2 = vpop.f32.mrb[11].mxu1  ;;  %v3034_v21 = vmax.f32 %v1666_v7, 0.0  ;;  %v1669_v24 = vadd.f32 %v2300_v63, %v2976_v12 }
 0x385   : > { %1723 = vadd.xlane.f32.xlu1 %v1722_v60  ;;  %v3048_v55 = vmax.f32 %v1658_v51, 0.0  ;;  %v1661_v28 = vadd.f32 %v2976_v12, %v1660_v2 }
 0x386   : > { %v1734_v27 = vsel %vm672_vm3, %v3034_v21, 0.0  ;;  %v3050_v15 = vmax.f32 %v1669_v24, 0.0  ;;  %v1778_v31 = vmul.f32 %v3034_v21, %v3034_v21 }
 0x387   : > { %1788 = vadd.xlane.f32.xlu0 %v1787_v3  ;;  %v1728_v29 = vsel %vm672_vm3, %v3048_v55, 0.0  ;;  %v3058_v32 = vmax.f32 %v1661_v28, 0.0  ;;  %v1776_v37 = vmul.f32 %v3048_v55, %v3048_v55 }
 0x388   : > { %v1737_v30 = vsel %vm672_vm3, %v3050_v15, 0.0  ;;  %v1814_v35 = vsel %vm672_vm3, %v1778_v31, 0.0  ;;  %v1779_v42 = vmul.f32 %v3050_v15, %v3050_v15 }
 0x389   : > { %1717 = vadd.xlane.f32.xlu1 %v1716_v4  ;;  %v2303_v5 = vpop.f32.mrb[12].mxu1  ;;  %v1731_v40 = vsel %vm672_vm3, %v3058_v32, 0.0  ;;  %v1808_v26 = vsel %vm672_vm3, %v1776_v37, 0.0  ;;  %v1777_v45 = vmul.f32 %v3058_v32, %v3058_v32 }
 0x38a   : > { %v1673_v13 = vpop.f32.mrb[13].mxu1  ;;  %v1682_v34 = vadd.f32 %v2303_v5, %v2976_v12  ;;  %v1817_v44 = vsel %vm672_vm3, %v1779_v42, 0.0 }
 0x38b   : > { %1726 = vadd.xlane.f32.xlu0 %v1725_v47  ;;  %v2304_v16 = vpop.f32.mrb[14].mxu1  ;;  %v1674_v38 = vadd.f32 %v2976_v12, %v1673_v13  ;;  %v1811_v53 = vsel %vm672_vm3, %v1777_v45, 0.0 }
 0x38c   : > { %v1676_v20 = vpop.f32.mrb[15].mxu1  ;;  %v3066_v39 = vmax.f32 %v1682_v34, 0.0  ;;  %v1685_v43 = vadd.f32 %v2304_v16, %v2976_v12 }
 0x38d   : > { %1803 = vadd.xlane.f32.xlu1 %v1802_v14  ;;  %v3080_v46 = vmax.f32 %v1674_v38, 0.0  ;;  %v1677_v50 = vadd.f32 %v2976_v12, %v1676_v20 }
 0x38e   : > { %v1746_v10 = vsel %vm672_vm3, %v3066_v39, 0.0  ;;  %v3082_v9 = vmax.f32 %v1685_v43, 0.0  ;;  %v1782_v12 = vmul.f32 %v3066_v39, %v3066_v39 }
 0x38f   : > { %1720 = vadd.xlane.f32.xlu0 %v1719_v22  ;;  %v1740_v54 = vsel %vm672_vm3, %v3080_v46, 0.0  ;;  %v1780_v56 = vmul.f32 %v3080_v46, %v3080_v46  ;;  %v3090_v57 = vmax.f32 %v1677_v50, 0.0  ;;  %v3120_v50 = vld [vmem:[%s3338_s7] ss:$0 sm:$0xff] }
 0x390   : > { %v1749_v58 = vsel %vm672_vm3, %v3082_v9, 0.0  ;;  %v1826_v62 = vsel %vm672_vm3, %v1782_v12, 0.0  ;;  %v1783_v2 = vmul.f32 %v3082_v9, %v3082_v9 }
 0x391   : > { %1797 = vadd.xlane.f32.xlu1 %v1796_v23  ;;  %v1820_v59 = vsel %vm672_vm3, %v1780_v56, 0.0  ;;  %v1743_v60 = vsel %vm672_vm3, %v3090_v57, 0.0  ;;  %v1781_v61 = vmul.f32 %v3090_v57, %v3090_v57  ;;  %v2267_v24 = vpop.f32.mrb[4].mxu0 }
 0x392   : > { %v1829_v17 = vsel %vm672_vm3, %v1783_v2, 0.0 }
 0x393   : > { %1806 = vadd.xlane.f32.xlu0 %v1805_v25  ;;  %v1823_v63 = vsel %vm672_vm3, %v1781_v61, 0.0 }
 0x395   : > { %1735 = vadd.xlane.f32.xlu1 %v1734_v27  ;;  %v844_v27 = vpop.f32.mrb[5].mxu0 }
 0x397   : > { %1800 = vadd.xlane.f32.xlu0 %v1799_v11 }
 0x399   : > { %1729 = vadd.xlane.f32.xlu1 %v1728_v29  ;;  %v2268_v29 = vpop.f32.mrb[6].mxu0 }
 0x39a   : > { %v847_v34 = vpop.f32.mrb[7].mxu0 }
 0x39b   : > { %1738 = vadd.xlane.f32.xlu0 %v1737_v30 }
 0x39d   : > { %1815 = vadd.xlane.f32.xlu1 %v1814_v35 }
 0x39f   : > { %1732 = vadd.xlane.f32.xlu0 %v1731_v40 }
 0x3a1   : > { %1809 = vadd.xlane.f32.xlu1 %v1808_v26 }
 0x3a3   : > { %1818 = vadd.xlane.f32.xlu0 %v1817_v44 }
 0x3a5   : > { %1747 = vadd.xlane.f32.xlu1 %v1746_v10 }
 0x3a7   : > { %1812 = vadd.xlane.f32.xlu0 %v1811_v53  ;;  %v2271_v53 = vpop.f32.mrb[8].mxu0 }
 0x3a9   : > { %1741 = vadd.xlane.f32.xlu1 %v1740_v54 }
 0x3ab   : > { %1750 = vadd.xlane.f32.xlu0 %v1749_v58 }
 0x3ad   : > { %1821 = vadd.xlane.f32.xlu1 %v1820_v59  ;;  %v860_v59 = vpop.f32.mrb[9].mxu0 }
 0x3ae   : > { %v2272_v12 = vpop.f32.mrb[10].mxu0 }
 0x3af   : > { %1744 = vadd.xlane.f32.xlu0 %v1743_v60 }
 0x3b1   : > { %1827 = vadd.xlane.f32.xlu1 %v1826_v62 }
 0x3b3   : > { %1824 = vadd.xlane.f32.xlu0 %v1823_v63  ;;  %v863_v63 = vpop.f32.mrb[11].mxu0 }
 0x3b4   : > { %v2275_v24 = vpop.f32.mrb[12].mxu0 }
 0x3b7   : > { %1830 = vadd.xlane.f32.xlu0 %v1829_v17 }
 0x404   : > { %v1712_v3 = vpop.xlane.xlu0 %1711 }
 0x405   : > { %v1754_v4 = vmul.f32 0.03125, %v1712_v3 }
 0x406   : > { %v1792_v48 = vpop.xlane.xlu1 %1791 }
 0x407   : > { %v1850_v5 = vmul.f32 %v1754_v4, %v1754_v4  ;;  %v1834_v47 = vmul.f32 0.03125, %v1792_v48  ;;  %v1914_v38 = vsub.f32 %v2980_v33, %v1754_v4  ;;  %v3125_v33 = vld [vmem:[%s3339_s8] ss:$0 sm:$0xff] }
 0x408   : > { %v1706_v7 = vpop.xlane.xlu0 %1705  ;;  %v3135_v4 = vld [vmem:[%s3340_s9] ss:$0 sm:$0xff] }
 0x409   : > { %v1866_v13 = vsub.f32 %v1834_v47, %v1850_v5  ;;  %v1752_v18 = vmul.f32 0.03125, %v1706_v7 }
 0x40a   : > { %v1709_v16 = vpop.xlane.xlu1 %1708 }
 0x40b   : > { %v1882_v14 = vadd.f32 1e-05, %v1866_v13  ;;  %v1848_v51 = vmul.f32 %v1752_v18, %v1752_v18  ;;  %v3110_v31 = vmul.f32 0.03125, %v1709_v16  ;;  %v1912_v13 = vsub.f32 %v2983_v36, %v1752_v18 }
 0x40c   : > { %v1715_v20 = vpop.xlane.xlu0 %1714 }
 0x40d   : > { %2490 = vrsqrt.f32 %v1882_v14  ;;  %v3106_v22 = vmul.f32 0.03125, %v1715_v20  ;;  %v1849_v26 = vmul.f32 %v3110_v31, %v3110_v31 }
 0x40e   : > { %v1786_v52 = vpop.xlane.xlu1 %1785 }
 0x40f   : > { %v1832_v23 = vmul.f32 0.03125, %v1786_v52  ;;  %v1851_v0 = vmul.f32 %v3106_v22, %v3106_v22 }
 0x410   : > { %v1795_v25 = vpop.xlane.xlu0 %1794 }
 0x411   : > { %v1864_v28 = vsub.f32 %v1832_v23, %v1848_v51  ;;  %v1835_v11 = vmul.f32 0.03125, %v1795_v25  ;;  %v1915_v25 = vsub.f32 %v2993_v8, %v3106_v22 }
 0x412   : > { %v1724_v30 = vpop.xlane.xlu1 %1723 }
 0x413   : > { %v1880_v35 = vadd.f32 1e-05, %v1864_v28  ;;  %v1867_v37 = vsub.f32 %v1835_v11, %v1851_v0  ;;  %v3115_v45 = vmul.f32 0.03125, %v1724_v30  ;;  %v876_v11 = vpop.f32.mrb[13].mxu0 }
 0x414   : > { %v1789_v40 = vpop.xlane.xlu0 %1788  ;;  %v2276_v34 = vpop.f32.mrb[14].mxu0 }
 0x415   : > { %2492 = vrsqrt.f32 %v1880_v35  ;;  %v1883_v42 = vadd.f32 1e-05, %v1867_v37  ;;  %v1833_v43 = vmul.f32 0.03125, %v1789_v40  ;;  %v1854_v2 = vmul.f32 %v3115_v45, %v3115_v45  ;;  %v879_v22 = vpop.f32.mrb[15].mxu0 }
 0x416   : > { %v1718_v44 = vpop.xlane.xlu1 %1717 }
 0x417   : > { %v2491_v10 = vpop.eup %2490  ;;  %2494 = vrsqrt.f32 %v1883_v42  ;;  %v1865_v54 = vsub.f32 %v1833_v43, %v1849_v26  ;;  %v3130_v17 = vmul.f32 0.03125, %v1718_v44 }
 0x418   : > { %v1727_v56 = vpop.xlane.xlu0 %1726  ;;  %v1930_v58 = vmul.f32 %v2491_v10, %v1914_v38  ;;  %v1913_v10 = vsub.f32 %v2990_v41, %v3110_v31 }
 0x419   : > { %v1881_v60 = vadd.f32 1e-05, %v1865_v54  ;;  %v3138_v47 = vmul.f32 0.03125, %v1727_v56  ;;  %v1852_v52 = vmul.f32 %v3130_v17, %v3130_v17 }
 0x41a   : > { %v1804_v61 = vpop.xlane.xlu1 %1803  ;;  %v1953_v62 = vmul.f32 %v3120_v50, %v1930_v58 }
 0x41b   : > { %v1838_v3 = vmul.f32 0.03125, %v1804_v61  ;;  %2496 = vrsqrt.f32 %v1881_v60  ;;  %v1855_v36 = vmul.f32 %v3138_v47, %v3138_v47 }
 0x41c   : > { %v1721_v48 = vpop.xlane.xlu0 %1720  ;;  %v1976_v5 = vadd.f32 %v3125_v33, %v1953_v62 }
 0x41d   : > { %v1870_v7 = vsub.f32 %v1838_v3, %v1854_v2  ;;  %v3149_v35 = vmul.f32 0.03125, %v1721_v48  ;;  %v1918_v48 = vsub.f32 %v3002_v49, %v3115_v45 }
 0x41e   : > { %v1798_v16 = vpop.xlane.xlu1 %1797  ;;  %v1999_v14 = vmul.f32 %v3135_v4, %v1976_v5 }
 0x41f   : > { %v2493_v20 = vpop.eup %2492  ;;  %v1886_v51 = vadd.f32 1e-05, %v1870_v7  ;;  %v1836_v23 = vmul.f32 0.03125, %v1798_v16  ;;  %v1853_v56 = vmul.f32 %v3149_v35, %v3149_v35 }
 0x420   : > { %v1807_v27 = vpop.xlane.xlu0 %1806  ;;  %v2019_v0 = vsel %vm672_vm3, %v1999_v14, 0.0  ;;  %v1928_v28 = vmul.f32 %v2493_v20, %v1912_v13 }
 0x421   : > { %v2495_v29 = vpop.eup %2494  ;;  %2498 = vrsqrt.f32 %v1886_v51  ;;  %v1868_v18 = vsub.f32 %v1836_v23, %v1852_v52  ;;  %v1839_v30 = vmul.f32 0.03125, %v1807_v27  ;;  %2020 = vadd.xlane.f32.xlu1 %v2019_v0  ;;  %v1916_v27 = vsub.f32 %v3016_v1, %v3130_v17 }
 0x422   : > { %v1736_v37 = vpop.xlane.xlu1 %1735  ;;  %v1951_v40 = vmul.f32 %v3120_v50, %v1928_v28  ;;  %v1931_v8 = vmul.f32 %v2495_v29, %v1915_v25 }
 0x423   : > { %v1884_v42 = vadd.f32 1e-05, %v1868_v18  ;;  %v1871_v38 = vsub.f32 %v1839_v30, %v1855_v36  ;;  %v3160_v61 = vmul.f32 0.03125, %v1736_v37  ;;  %v1919_v30 = vsub.f32 %v3018_v19, %v3138_v47 }
 0x424   : > { %v1801_v26 = vpop.xlane.xlu0 %1800  ;;  %v1974_v43 = vadd.f32 %v3125_v33, %v1951_v40  ;;  %v1954_v44 = vmul.f32 %v3120_v50, %v1931_v8 }
 0x425   : > { %2500 = vrsqrt.f32 %v1884_v42  ;;  %v1887_v53 = vadd.f32 1e-05, %v1871_v38  ;;  %v2497_v54 = vpop.eup %2496  ;;  %v1837_v58 = vmul.f32 0.03125, %v1801_v26  ;;  %v1858_v14 = vmul.f32 %v3160_v61, %v3160_v61 }
 0x426   : > { %v1730_v59 = vpop.xlane.xlu1 %1729  ;;  %v1997_v12 = vmul.f32 %v3135_v4, %v1974_v43  ;;  %v1977_v60 = vadd.f32 %v3125_v33, %v1954_v44  ;;  %v1929_v62 = vmul.f32 %v2497_v54, %v1913_v10 }
 0x427   : > { %2502 = vrsqrt.f32 %v1887_v53  ;;  %v1869_v63 = vsub.f32 %v1837_v58, %v1853_v56  ;;  %v3170_v20 = vmul.f32 0.03125, %v1730_v59  ;;  %v1917_v59 = vsub.f32 %v3026_v6, %v3149_v35 }
 0x428   : > { %v1739_v2 = vpop.xlane.xlu0 %1738  ;;  %v2013_v41 = vsel %vm672_vm3, %v1997_v12, 0.0  ;;  %v2000_v31 = vmul.f32 %v3135_v4, %v1977_v60  ;;  %v1952_v3 = vmul.f32 %v3120_v50, %v1929_v62 }
 0x429   : > { %2014 = vadd.xlane.f32.xlu1 %v2013_v41  ;;  %v1885_v5 = vadd.f32 1e-05, %v1869_v63  ;;  %v3173_v25 = vmul.f32 0.03125, %v1739_v2  ;;  %v1856_v29 = vmul.f32 %v3170_v20, %v3170_v20 }
 0x42a   : > { %v1816_v7 = vpop.xlane.xlu1 %1815  ;;  %v2022_v13 = vsel %vm672_vm3, %v2000_v31, 0.0  ;;  %v1975_v51 = vadd.f32 %v3125_v33, %v1952_v3 }
 0x42b   : > { %v2499_v16 = vpop.eup %2498  ;;  %v1842_v52 = vmul.f32 0.03125, %v1816_v7  ;;  %2023 = vadd.xlane.f32.xlu0 %v2022_v13  ;;  %2504 = vrsqrt.f32 %v1885_v5  ;;  %v1859_v1 = vmul.f32 %v3173_v25, %v3173_v25 }
 0x42c   : > { %v1733_v23 = vpop.xlane.xlu0 %1732  ;;  %v1934_v24 = vmul.f32 %v2499_v16, %v1918_v48  ;;  %v1998_v45 = vmul.f32 %v3135_v4, %v1975_v51  ;;  %v1922_v16 = vsub.f32 %v3034_v21, %v3160_v61  ;;  %v1920_v61 = vsub.f32 %v3048_v55, %v3170_v20 }
 0x42d   : > { %v1874_v49 = vsub.f32 %v1842_v52, %v1858_v14  ;;  %v3187_v38 = vmul.f32 0.03125, %v1733_v23 }
 0x42e   : > { %v1810_v0 = vpop.xlane.xlu1 %1809  ;;  %v1957_v28 = vmul.f32 %v3120_v50, %v1934_v24  ;;  %v2016_v34 = vsel %vm672_vm3, %v1998_v45, 0.0 }
 0x42f   : > { %v2501_v11 = vpop.eup %2500  ;;  %v1890_v36 = vadd.f32 1e-05, %v1874_v49  ;;  %v1840_v18 = vmul.f32 0.03125, %v1810_v0  ;;  %2017 = vadd.xlane.f32.xlu0 %v2016_v34  ;;  %v1857_v62 = vmul.f32 %v3187_v38, %v3187_v38  ;;  %v1923_v34 = vsub.f32 %v3050_v15, %v3173_v25 }
 0x430   : > { %v1819_v37 = vpop.xlane.xlu0 %1818  ;;  %v1980_v40 = vadd.f32 %v3125_v33, %v1957_v28  ;;  %v1932_v8 = vmul.f32 %v2501_v11, %v1916_v27 }
 0x431   : > { %v2503_v22 = vpop.eup %2502  ;;  %2506 = vrsqrt.f32 %v1890_v36  ;;  %v1872_v17 = vsub.f32 %v1840_v18, %v1856_v29  ;;  %v1843_v42 = vmul.f32 0.03125, %v1819_v37 }
 0x432   : > { %v1748_v26 = vpop.xlane.xlu1 %1747  ;;  %v2003_v43 = vmul.f32 %v3135_v4, %v1980_v40  ;;  %v1955_v19 = vmul.f32 %v3120_v50, %v1932_v8  ;;  %v1935_v47 = vmul.f32 %v2503_v22, %v1919_v30 }
 0x433   : > { %v1888_v44 = vadd.f32 1e-05, %v1872_v17  ;;  %v1875_v10 = vsub.f32 %v1843_v42, %v1859_v1  ;;  %v3208_v24 = vmul.f32 0.03125, %v1748_v26 }
 0x434   : > { %v1813_v53 = vpop.xlane.xlu0 %1812  ;;  %v2031_v54 = vsel %vm672_vm3, %v2003_v43, 0.0  ;;  %v1978_v56 = vadd.f32 %v3125_v33, %v1955_v19  ;;  %v1958_v58 = vmul.f32 %v3120_v50, %v1935_v47 }
 0x435   : > { %2508 = vrsqrt.f32 %v1888_v44  ;;  %v1891_v12 = vadd.f32 1e-05, %v1875_v10  ;;  %2032 = vadd.xlane.f32.xlu1 %v2031_v54  ;;  %v2505_v60 = vpop.eup %2504  ;;  %v1841_v63 = vmul.f32 0.03125, %v1813_v53  ;;  %v1862_v37 = vmul.f32 %v3208_v24, %v3208_v24 }
 0x436   : > { %v1742_v2 = vpop.xlane.xlu1 %1741  ;;  %v2001_v41 = vmul.f32 %v3135_v4, %v1978_v56  ;;  %v1981_v31 = vadd.f32 %v3125_v33, %v1958_v58  ;;  %v1933_v48 = vmul.f32 %v2505_v60, %v1917_v59  ;;  %v1921_v53 = vsub.f32 %v3058_v32, %v3187_v38 }
 0x437   : > { %2510 = vrsqrt.f32 %v1891_v12  ;;  %v3200_v3 = vmul.f32 0.03125, %v1742_v2  ;;  %v1873_v5 = vsub.f32 %v1841_v63, %v1857_v62 }
 0x438   : > { %v1751_v7 = vpop.xlane.xlu0 %1750  ;;  %v2025_v6 = vsel %vm672_vm3, %v2001_v41, 0.0  ;;  %v2004_v35 = vmul.f32 %v3135_v4, %v1981_v31  ;;  %v1956_v13 = vmul.f32 %v3120_v50, %v1933_v48 }
 0x439   : > { %2026 = vadd.xlane.f32.xlu1 %v2025_v6  ;;  %v1889_v14 = vadd.f32 1e-05, %v1873_v5  ;;  %v1860_v49 = vmul.f32 %v3200_v3, %v3200_v3  ;;  %v3223_v22 = vmul.f32 0.03125, %v1751_v7  ;;  %v1924_v6 = vsub.f32 %v3080_v46, %v3200_v3 }
 0x43a   : > { %v1822_v52 = vpop.xlane.xlu1 %1821  ;;  %v2034_v51 = vsel %vm672_vm3, %v2004_v35, 0.0  ;;  %v1979_v27 = vadd.f32 %v3125_v33, %v1956_v13 }
 0x43b   : > { %v2507_v23 = vpop.eup %2506  ;;  %v1844_v45 = vmul.f32 0.03125, %v1822_v52  ;;  %2035 = vadd.xlane.f32.xlu0 %v2034_v51  ;;  %2512 = vrsqrt.f32 %v1889_v14  ;;  %v1863_v12 = vmul.f32 %v3223_v22, %v3223_v22  ;;  %v1926_v51 = vsub.f32 %v3066_v39, %v3208_v24 }
 0x43c   : > { %v1745_v0 = vpop.xlane.xlu0 %1744  ;;  %v1938_v28 = vmul.f32 %v2507_v23, %v1922_v16  ;;  %v2002_v21 = vmul.f32 %v3135_v4, %v1979_v27  ;;  %v1927_v39 = vsub.f32 %v3082_v9, %v3223_v22 }
 0x43d   : > { %v1876_v11 = vsub.f32 %v1844_v45, %v1860_v49  ;;  %v3213_v29 = vmul.f32 0.03125, %v1745_v0 }
 0x43e   : > { %v1828_v36 = vpop.xlane.xlu1 %1827  ;;  %v1961_v18 = vmul.f32 %v3120_v50, %v1938_v28  ;;  %v2028_v1 = vsel %vm672_vm3, %v2002_v21, 0.0 }
 0x43f   : > { %v2509_v30 = vpop.eup %2508  ;;  %v1892_v40 = vadd.f32 1e-05, %v1876_v11  ;;  %v1846_v8 = vmul.f32 0.03125, %v1828_v36  ;;  %v1861_v26 = vmul.f32 %v3213_v29, %v3213_v29  ;;  %2029 = vadd.xlane.f32.xlu0 %v2028_v1  ;;  %v1925_v46 = vsub.f32 %v3090_v57, %v3213_v29 }
 0x440   : > { %v1825_v17 = vpop.xlane.xlu0 %1824  ;;  %v1984_v42 = vadd.f32 %v3125_v33, %v1961_v18  ;;  %v1936_v55 = vmul.f32 %v2509_v30, %v1920_v61 }
 0x441   : > { %v2511_v20 = vpop.eup %2510  ;;  %2514 = vrsqrt.f32 %v1892_v40  ;;  %v1878_v43 = vsub.f32 %v1846_v8, %v1862_v37  ;;  %v1845_v15 = vmul.f32 0.03125, %v1825_v17  ;;  %v3271_v17 = vld [vmem:[#allocation2] ss:$0 sm:$0xff] }
 0x442   : > { %v2007_v25 = vmul.f32 %v3135_v4, %v1984_v42  ;;  %v1959_v19 = vmul.f32 %v3120_v50, %v1936_v55  ;;  %v1939_v47 = vmul.f32 %v2511_v20, %v1923_v34 }
 0x443   : > { %v1894_v44 = vadd.f32 1e-05, %v1878_v43  ;;  %v1877_v10 = vsub.f32 %v1845_v15, %v1861_v26 }
 0x444   : > { %v1831_v54 = vpop.xlane.xlu0 %1830  ;;  %v2043_v56 = vsel %vm672_vm3, %v2007_v25, 0.0  ;;  %v1982_v58 = vadd.f32 %v3125_v33, %v1959_v19  ;;  %v1962_v59 = vmul.f32 %v3120_v50, %v1939_v47 }
 0x445   : > { %2516 = vrsqrt.f32 %v1894_v44  ;;  %v1893_v60 = vadd.f32 1e-05, %v1877_v10  ;;  %v1847_v62 = vmul.f32 0.03125, %v1831_v54  ;;  %2044 = vadd.xlane.f32.xlu1 %v2043_v56  ;;  %v2513_v63 = vpop.eup %2512 }
 0x446   : > { %v2005_v2 = vmul.f32 %v3135_v4, %v1982_v58  ;;  %v1985_v41 = vadd.f32 %v3125_v33, %v1962_v59  ;;  %v1937_v38 = vmul.f32 %v2513_v63, %v1921_v53 }
 0x447   : > { %2518 = vrsqrt.f32 %v1893_v60  ;;  %v1879_v32 = vsub.f32 %v1847_v62, %v1863_v12 }
 0x448   : > { %v2037_v31 = vsel %vm672_vm3, %v2005_v2, 0.0  ;;  %v2008_v48 = vmul.f32 %v3135_v4, %v1985_v41  ;;  %v1960_v7 = vmul.f32 %v3120_v50, %v1937_v38 }
 0x449   : > { %v1895_v5 = vadd.f32 1e-05, %v1879_v32  ;;  %2038 = vadd.xlane.f32.xlu1 %v2037_v31 }
 0x44a   : > { %v2046_v35 = vsel %vm672_vm3, %v2008_v48, 0.0  ;;  %v1983_v16 = vadd.f32 %v3125_v33, %v1960_v7 }
 0x44b   : > { %v2515_v13 = vpop.eup %2514  ;;  %2520 = vrsqrt.f32 %v1895_v5  ;;  %2047 = vadd.xlane.f32.xlu0 %v2046_v35 }
 0x44c   : > { %v1940_v14 = vmul.f32 %v2515_v13, %v1924_v6  ;;  %v2006_v52 = vmul.f32 %v3135_v4, %v1983_v16 }
 0x44e   : > { %v1963_v23 = vmul.f32 %v3120_v50, %v1940_v14  ;;  %v2040_v45 = vsel %vm672_vm3, %v2006_v52, 0.0 }
 0x44f   : > { %v2517_v49 = vpop.eup %2516  ;;  %2041 = vadd.xlane.f32.xlu0 %v2040_v45 }
 0x450   : > { %v1986_v3 = vadd.f32 %v3125_v33, %v1963_v23  ;;  %v1942_v27 = vmul.f32 %v2517_v49, %v1926_v51 }
 0x451   : > { %v2519_v0 = vpop.eup %2518 }
 0x452   : > { %v2009_v28 = vmul.f32 %v3135_v4, %v1986_v3  ;;  %v1965_v11 = vmul.f32 %v3120_v50, %v1942_v27  ;;  %v1941_v21 = vmul.f32 %v2519_v0, %v1925_v46 }
 0x454   : > { %v2049_v24 = vsel %vm672_vm3, %v2009_v28, 0.0  ;;  %v1988_v61 = vadd.f32 %v3125_v33, %v1965_v11  ;;  %v1964_v36 = vmul.f32 %v3120_v50, %v1941_v21 }
 0x455   : > { %v2521_v57 = vpop.eup %2520  ;;  %2050 = vadd.xlane.f32.xlu1 %v2049_v24 }
 0x456   : > { %v2011_v29 = vmul.f32 %v3135_v4, %v1988_v61  ;;  %v1987_v18 = vadd.f32 %v3125_v33, %v1964_v36  ;;  %v1943_v30 = vmul.f32 %v2521_v57, %v1927_v39 }
 0x458   : > { %v2055_v34 = vsel %vm672_vm3, %v2011_v29, 0.0  ;;  %v2010_v37 = vmul.f32 %v3135_v4, %v1987_v18  ;;  %v1966_v9 = vmul.f32 %v3120_v50, %v1943_v30 }
 0x459   : > { %2056 = vadd.xlane.f32.xlu1 %v2055_v34 }
 0x45a   : > { %v2052_v40 = vsel %vm672_vm3, %v2010_v37, 0.0  ;;  %v1989_v8 = vadd.f32 %v3125_v33, %v1966_v9 }
 0x45b   : > { %2053 = vadd.xlane.f32.xlu0 %v2052_v40 }
 0x45c   : > { %v2012_v22 = vmul.f32 %v3135_v4, %v1989_v8 }
 0x45e   : > { %v2058_v1 = vsel %vm672_vm3, %v2012_v22, 0.0 }
 0x45f   : > { %2059 = vadd.xlane.f32.xlu0 %v2058_v1 }
 0x4ae   : > { %v2021_v42 = vpop.xlane.xlu1 %2020 }
 0x4af   : > { %v2070_v55 = vadd.f32 %v3271_v17, %v2021_v42 }
 0x4b1   : > { %v2086_v50 = vmax.f32 %v2070_v55, 0.0 }
 0x4b3   : > { %2103 = vst.msk [vmem:[%s3279_s14 + $0x10] sm:$0xff] %vm2100_vm6, %v2086_v50 }
 0x4b6   : > { %v2015_v33 = vpop.xlane.xlu1 %2014 }
 0x4b7   : > { %v2068_v4 = vadd.f32 %v3271_v17, %v2015_v33 }
 0x4b8   : > { %v2024_v20 = vpop.xlane.xlu0 %2023 }
 0x4b9   : > { %v2084_v26 = vmax.f32 %v2068_v4, 0.0  ;;  %v2071_v43 = vadd.f32 %v3271_v17, %v2024_v20 }
 0x4bb   : > { %2101 = vst.msk [vmem:[%s3279_s14] sm:$0xff] %vm2100_vm6, %v2084_v26  ;;  %v2087_v15 = vmax.f32 %v2071_v43, 0.0 }
 0x4bc   : > { %v2018_v25 = vpop.xlane.xlu0 %2017 }
 0x4bd   : > { %2104 = vst.msk [vmem:[%s3279_s14 + $0x18] sm:$0xff] %vm2100_vm6, %v2087_v15  ;;  %v2069_v19 = vadd.f32 %v3271_v17, %v2018_v25 }
 0x4bf   : > { %v2085_v47 = vmax.f32 %v2069_v19, 0.0 }
 0x4c1   : > { %2102 = vst.msk [vmem:[%s3279_s14 + $0x8] sm:$0xff] %vm2100_vm6, %v2085_v47 }
 0x4c2   : > { %v2033_v44 = vpop.xlane.xlu1 %2032 }
 0x4c3   : > { %v2074_v10 = vadd.f32 %v3271_v17, %v2033_v44 }
 0x4c5   : > { %v2090_v53 = vmax.f32 %v2074_v10, 0.0 }
 0x4c6   : > { %v2027_v54 = vpop.xlane.xlu1 %2026 }
 0x4c7   : > { %2107 = vst.msk [vmem:[%s3279_s14 + $0x30] sm:$0xff] %vm2100_vm6, %v2090_v53  ;;  %v2072_v56 = vadd.f32 %v3271_v17, %v2027_v54 }
 0x4c8   : > { %v2036_v58 = vpop.xlane.xlu0 %2035 }
 0x4c9   : > { %v2088_v59 = vmax.f32 %v2072_v56, 0.0  ;;  %v2075_v12 = vadd.f32 %v3271_v17, %v2036_v58 }
 0x4cb   : > { %2105 = vst.msk [vmem:[%s3279_s14 + $0x20] sm:$0xff] %vm2100_vm6, %v2088_v59  ;;  %v2091_v60 = vmax.f32 %v2075_v12, 0.0 }
 0x4cc   : > { %v2030_v62 = vpop.xlane.xlu0 %2029 }
 0x4cd   : > { %2108 = vst.msk [vmem:[%s3279_s14 + $0x38] sm:$0xff] %vm2100_vm6, %v2091_v60  ;;  %v2073_v63 = vadd.f32 %v3271_v17, %v2030_v62 }
 0x4cf   : > { %v2089_v2 = vmax.f32 %v2073_v63, 0.0 }
 0x4d1   : > { %2106 = vst.msk [vmem:[%s3279_s14 + $0x28] sm:$0xff] %vm2100_vm6, %v2089_v2 }
 0x4d2   : > { %v2045_v41 = vpop.xlane.xlu1 %2044 }
 0x4d3   : > { %v2078_v32 = vadd.f32 %v3271_v17, %v2045_v41 }
 0x4d5   : > { %v2094_v38 = vmax.f32 %v2078_v32, 0.0 }
 0x4d6   : > { %v2039_v31 = vpop.xlane.xlu1 %2038 }
 0x4d7   : > { %2111 = vst.msk [vmem:[%s3279_s14 + $0x50] sm:$0xff] %vm2100_vm6, %v2094_v38  ;;  %v2076_v48 = vadd.f32 %v3271_v17, %v2039_v31 }
 0x4d8   : > { %v2048_v5 = vpop.xlane.xlu0 %2047 }
 0x4d9   : > { %v2092_v7 = vmax.f32 %v2076_v48, 0.0  ;;  %v2079_v6 = vadd.f32 %v3271_v17, %v2048_v5 }
 0x4db   : > { %2109 = vst.msk [vmem:[%s3279_s14 + $0x40] sm:$0xff] %vm2100_vm6, %v2092_v7  ;;  %v2095_v35 = vmax.f32 %v2079_v6, 0.0 }
 0x4dc   : > { %v2042_v13 = vpop.xlane.xlu0 %2041 }
 0x4dd   : > { %2112 = vst.msk [vmem:[%s3279_s14 + $0x58] sm:$0xff] %vm2100_vm6, %v2095_v35  ;;  %v2077_v16 = vadd.f32 %v3271_v17, %v2042_v13 }
 0x4df   : > { %v2093_v14 = vmax.f32 %v2077_v16, 0.0 }
 0x4e1   : > { %2110 = vst.msk [vmem:[%s3279_s14 + $0x48] sm:$0xff] %vm2100_vm6, %v2093_v14 }
 0x4e2   : > { %v2051_v52 = vpop.xlane.xlu1 %2050 }
 0x4e3   : > { %v2080_v51 = vadd.f32 %v3271_v17, %v2051_v52 }
 0x4e5   : > { %v2096_v23 = vmax.f32 %v2080_v51, 0.0 }
 0x4e6   : > { %v2057_v49 = vpop.xlane.xlu1 %2056 }
 0x4e7   : > { %2113 = vst.msk [vmem:[%s3279_s14 + $0x60] sm:$0xff] %vm2100_vm6, %v2096_v23  ;;  %v2082_v45 = vadd.f32 %v3271_v17, %v2057_v49 }
 0x4e8   : > { %v2054_v46 = vpop.xlane.xlu0 %2053 }
 0x4e9   : > { %v2098_v3 = vmax.f32 %v2082_v45, 0.0  ;;  %v2081_v27 = vadd.f32 %v3271_v17, %v2054_v46 }
 0x4eb   : > { %2115 = vst.msk [vmem:[%s3279_s14 + $0x70] sm:$0xff] %vm2100_vm6, %v2098_v3  ;;  %v2097_v0 = vmax.f32 %v2081_v27, 0.0 }
 0x4ec   : > { %v2060_v28 = vpop.xlane.xlu0 %2059 }
 0x4ed   : > { %2114 = vst.msk [vmem:[%s3279_s14 + $0x68] sm:$0xff] %vm2100_vm6, %v2097_v0  ;;  %v2083_v11 = vadd.f32 %v3271_v17, %v2060_v28 }
 0x4ef   : > { %v2099_v21 = vmax.f32 %v2083_v11, 0.0 }
 0x4f1   : > { %2116 = vst.msk [vmem:[%s3279_s14 + $0x78] sm:$0xff] %vm2100_vm6, %v2099_v21 }
 0x4f2 PF: > { %s23_s19 = sadd.s32 1, %s2528_s19  }
 0x4f3   : > { %p20_p4 = scmp.ge.s32.totalorder %s23_s19, 4  }
 0x4f5   :  { %22 = sbr.rel (!%p20_p4) target bundleno = 3 (0x3), region = 94 }

</bundles_post_ra>
